<compile_context>
chip_gen: v5e
topology: v5e:2x2
jax: 0.10.0
libtpu: 0.0.40
codegen_flags: <defaults>
</compile_context>

<pallas_src>
import jax
import jax.numpy as jnp
import numpy as np
from jax.experimental import pallas as pl
from jax.experimental.pallas import tpu as pltpu


# ----------------------------- Pallas kernel ---------------------------------
def forecaster_kernel(x_ref, wih1_ref, b1_ref, whh1_ref,
                      w2_ref, b2_ref,
                      wfc1_ref, bfc1_ref,
                      wdnn_ref, bdnn_ref,
                      wout_ref, bout_ref,
                      out_ref):
    B, S = x_ref.shape
    H = whh1_ref.shape[0]
    bf16 = jnp.bfloat16

    x = x_ref[...]            # (B, S)     f32
    wih1 = wih1_ref[...]      # (1, 4H)    f32  layer-1 input weight (input_size = 1)
    b1 = b1_ref[...]          # (1, 4H)    f32  b_ih + b_hh combined
    whh1 = whh1_ref[...]      # (H, 4H)    bf16
    w2 = w2_ref[...]          # (2H, 4H)   bf16 fused [W_ih2; W_hh2]
    b2 = b2_ref[...]          # (1, 4H)    f32

    def lstm_cell(gates, c):
        # PyTorch gate order: i, f, g, o.  Activations on the full (B, 4H) vreg.
        sig = jax.nn.sigmoid(gates)
        th = jnp.tanh(gates)
        i = sig[:, 0 * H:1 * H]
        f = sig[:, 1 * H:2 * H]
        g = th[:, 2 * H:3 * H]
        o = sig[:, 3 * H:4 * H]
        c_new = f * c + i * g
        h_new = o * jnp.tanh(c_new)
        return h_new, c_new

    # Hoisted layer-1 input projection: independent of the recurrence, so it is
    # computed up-front and pipelines off the serial critical path.
    pre1 = [x[:, t:t + 1] * wih1 + b1 for t in range(S)]   # S x (B, 4H) f32

    h1 = jnp.zeros((B, H), jnp.float32)
    c1 = jnp.zeros((B, H), jnp.float32)
    h2 = jnp.zeros((B, H), jnp.float32)
    c2 = jnp.zeros((B, H), jnp.float32)
    fc1_acc = jnp.zeros((B, H), jnp.float32)

    for t in range(S):                      # static unroll over sequence
        gates1 = pre1[t] + jnp.dot(h1.astype(bf16), whh1,
                                   preferred_element_type=jnp.float32)
        h1, c1 = lstm_cell(gates1, c1)

        # fused layer-2 gates: single K=2H matmul per step
        h12 = jnp.concatenate([h1, h2], axis=1).astype(bf16)   # (B, 2H)
        gates2 = jnp.dot(h12, w2, preferred_element_type=jnp.float32) + b2
        h2, c2 = lstm_cell(gates2, c2)

        # fc1 folded into the loop:  hflat @ Wfc1 == sum_t h2_t @ Wfc1[t*H:(t+1)*H, :]
        # (matches torch's batch_first .view(B, -1) time-major flatten)
        fc1_acc = fc1_acc + jnp.dot(h2.astype(bf16), wfc1_ref[t],
                                    preferred_element_type=jnp.float32)

    z = fc1_acc + bfc1_ref[...]             # (B, H)

    # deep dense stack: (ReLU, Linear(H,H)) x 9, then (ReLU, Linear(H,n_out))
    n_hidden_layers = wdnn_ref.shape[0]
    for i in range(n_hidden_layers):
        z = jnp.maximum(z, 0.0)
        z = jnp.dot(z.astype(bf16), wdnn_ref[i],
                    preferred_element_type=jnp.float32) + bdnn_ref[i]
    z = jnp.maximum(z, 0.0)
    out_ref[...] = (jnp.dot(z.astype(bf16), wout_ref[...],
                            preferred_element_type=jnp.float32)
                    + bout_ref[...])


# ----------------------------- wrapper ---------------------------------------
def lstm_forecaster_pallas(x, params):
    B, S = x.shape
    H = params["w_hh1"].shape[0]
    n_outputs = params["b_out"].shape[-1]
    n_dense = params["w_dnn"].shape[0]
    bf16 = jnp.bfloat16

    # Fuse layer-2 input/recurrent weights:  [W_ih2; W_hh2] -> (2H, 4H)
    w2 = jnp.concatenate([params["w_ih2"], params["w_hh2"]], axis=0)
    # Reshape fc1 weight (S*H, H) -> (S, H, H) for per-timestep accumulation.
    wfc1_r = params["w_fc1"].reshape(S, H, H)

    operands = (
        x.astype(jnp.float32),
        params["w_ih1"].astype(jnp.float32),   # VPU path, keep f32
        params["b1"].astype(jnp.float32),
        params["w_hh1"].astype(bf16),          # MXU operands in bf16, f32 accumulate
        w2.astype(bf16),
        params["b2"].astype(jnp.float32),
        wfc1_r.astype(bf16),
        params["b_fc1"].astype(jnp.float32),
        params["w_dnn"].astype(bf16),
        params["b_dnn"].astype(jnp.float32),
        params["w_out"].astype(bf16),
        params["b_out"].astype(jnp.float32),
    )

    # Advisory cost estimate for XLA scheduling around the custom call.
    flops = int(2 * B * S * (H * 4 * H + 2 * H * 4 * H + H * H)
                + 2 * B * (n_dense * H * H + H * n_outputs))
    transcendentals = int(B * S * 2 * (2 * 4 * H + H))
    bytes_accessed = int(sum(int(np.prod(o.shape)) * o.dtype.itemsize for o in operands)
                         + B * n_outputs * 4)

    vmem = pl.BlockSpec(memory_space=pltpu.MemorySpace.VMEM)
    return pl.pallas_call(
        forecaster_kernel,
        out_shape=jax.ShapeDtypeStruct((B, n_outputs), jnp.float32),
        in_specs=[vmem] * len(operands),
        out_specs=vmem,
        cost_estimate=pl.CostEstimate(flops=flops,
                                      transcendentals=transcendentals,
                                      bytes_accessed=bytes_accessed),
        compiler_params=pltpu.CompilerParams(),
    )(*operands)


# ----------------------------- pure-JAX reference ----------------------------
def lstm_forecaster_ref(x, params):
    B, S = x.shape
    H = params["w_hh1"].shape[0]

    def cell(gates, c):
        i = jax.nn.sigmoid(gates[:, 0 * H:1 * H])
        f = jax.nn.sigmoid(gates[:, 1 * H:2 * H])
        g = jnp.tanh(gates[:, 2 * H:3 * H])
        o = jax.nn.sigmoid(gates[:, 3 * H:4 * H])
        c_new = f * c + i * g
        return o * jnp.tanh(c_new), c_new

    h1 = c1 = h2 = c2 = jnp.zeros((B, H), jnp.float32)
    hs = []
    for t in range(S):
        x_t = x[:, t:t + 1]
        g1 = x_t * params["w_ih1"] + h1 @ params["w_hh1"] + params["b1"]
        h1, c1 = cell(g1, c1)
        g2 = h1 @ params["w_ih2"] + h2 @ params["w_hh2"] + params["b2"]
        h2, c2 = cell(g2, c2)
        hs.append(h2)
    z = jnp.concatenate(hs, axis=1) @ params["w_fc1"] + params["b_fc1"]
    for i in range(params["w_dnn"].shape[0]):
        z = jnp.maximum(z, 0.0)
        z = z @ params["w_dnn"][i] + params["b_dnn"][i]
    z = jnp.maximum(z, 0.0)
    return z @ params["w_out"] + params["b_out"]


# ----------------------------- param init ------------------------------------
def init_params(key, n_features, n_hidden, n_outputs, sequence_len,
                n_deep_layers=10):
    H = n_hidden
    ks = jax.random.split(key, 16)
    s = 1.0 / np.sqrt(H)

    def u(k, shape):
        return jax.random.uniform(k, shape, jnp.float32, -s, s)

    n_hidden_dense = n_deep_layers - 1  # last deep layer maps H -> n_outputs
    return {
        # LSTM layer 1 (input_size = n_features = 1), pre-transposed to (in, 4H)
        "w_ih1": u(ks[0], (n_features, 4 * H)),
        "w_hh1": u(ks[1], (H, 4 * H)),
        "b1":    u(ks[2], (1, 4 * H)) + u(ks[3], (1, 4 * H)),   # b_ih + b_hh
        # LSTM layer 2
        "w_ih2": u(ks[4], (H, 4 * H)),
        "w_hh2": u(ks[5], (H, 4 * H)),
        "b2":    u(ks[6], (1, 4 * H)) + u(ks[7], (1, 4 * H)),
        # fc1: Linear(H*seq, H), pre-transposed
        "w_fc1": jax.random.uniform(ks[8], (H * sequence_len, H), jnp.float32,
                                    -1.0 / np.sqrt(H * sequence_len),
                                    1.0 / np.sqrt(H * sequence_len)),
        "b_fc1": u(ks[9], (1, H)),
        # 9 hidden dense layers Linear(H, H), pre-transposed, stacked
        "w_dnn": u(ks[10], (n_hidden_dense, H, H)),
        "b_dnn": u(ks[11], (n_hidden_dense, 1, H)),
        # final Linear(H, n_outputs), pre-transposed
        "w_out": u(ks[12], (H, n_outputs)),
        "b_out": u(ks[13], (1, n_outputs)),
    }


# ----------------------------- main -------------------------------------------
if __name__ == "__main__":
    n_features, n_hidden, n_outputs = 1, 32, 4
    sequence_len, n_lstm_layers, n_deep_layers = 8, 2, 10
    batch = 8

    key = jax.random.PRNGKey(0)
    k_x, k_p = jax.random.split(key)
    x = jax.random.normal(k_x, (batch, sequence_len), jnp.float32)
    params = init_params(k_p, n_features, n_hidden, n_outputs,
                         sequence_len, n_deep_layers)

    out = lstm_forecaster_pallas(x, params)
    out = jax.block_until_ready(out)

    # Reference is pure f32; the kernel feeds the MXU bf16 operands (f32 accumulate),
    # so tolerance is relaxed accordingly.
    ref = lstm_forecaster_ref(x, params)
    np.testing.assert_allclose(np.asarray(out), np.asarray(ref),
                               rtol=3e-2, atol=3e-2)
    assert out.shape == (batch, n_outputs)
    print("KERNEL_OK")
</pallas_src>

<mosaic_0001>
module attributes {stable_mosaic.version = 11 : i64} {
  func.func @forecaster_kernel(%arg0: memref<8x8xf32, #tpu.memory_space<vmem>>, %arg1: memref<1x128xf32, #tpu.memory_space<vmem>>, %arg2: memref<1x128xf32, #tpu.memory_space<vmem>>, %arg3: memref<32x128xbf16, #tpu.memory_space<vmem>>, %arg4: memref<64x128xbf16, #tpu.memory_space<vmem>>, %arg5: memref<1x128xf32, #tpu.memory_space<vmem>>, %arg6: memref<8x32x32xbf16, #tpu.memory_space<vmem>>, %arg7: memref<1x32xf32, #tpu.memory_space<vmem>>, %arg8: memref<9x32x32xbf16, #tpu.memory_space<vmem>>, %arg9: memref<9x1x32xf32, #tpu.memory_space<vmem>>, %arg10: memref<32x4xbf16, #tpu.memory_space<vmem>>, %arg11: memref<1x4xf32, #tpu.memory_space<vmem>>, %arg12: memref<8x4xf32, #tpu.memory_space<vmem>>) attributes {dimension_semantics = [], scalar_prefetch = 0 : i64, scratch_operands = 0 : i64, tpu.core_type = #tpu.core_type<tc>} {
    %c0 = arith.constant 0 : index
    %c0_0 = arith.constant 0 : index
    %0 = vector.load %arg0[%c0, %c0_0] : memref<8x8xf32, #tpu.memory_space<vmem>>, vector<8x8xf32>
    %c0_1 = arith.constant 0 : index
    %c0_2 = arith.constant 0 : index
    %1 = vector.load %arg1[%c0_1, %c0_2] : memref<1x128xf32, #tpu.memory_space<vmem>>, vector<1x128xf32>
    %c0_3 = arith.constant 0 : index
    %c0_4 = arith.constant 0 : index
    %2 = vector.load %arg2[%c0_3, %c0_4] : memref<1x128xf32, #tpu.memory_space<vmem>>, vector<1x128xf32>
    %c0_5 = arith.constant 0 : index
    %c0_6 = arith.constant 0 : index
    %3 = vector.load %arg3[%c0_5, %c0_6] : memref<32x128xbf16, #tpu.memory_space<vmem>>, vector<32x128xbf16>
    %c0_7 = arith.constant 0 : index
    %c0_8 = arith.constant 0 : index
    %4 = vector.load %arg4[%c0_7, %c0_8] : memref<64x128xbf16, #tpu.memory_space<vmem>>, vector<64x128xbf16>
    %c0_9 = arith.constant 0 : index
    %c0_10 = arith.constant 0 : index
    %5 = vector.load %arg5[%c0_9, %c0_10] : memref<1x128xf32, #tpu.memory_space<vmem>>, vector<1x128xf32>
    %6 = vector.extract_strided_slice %0 {offsets = [0, 0], sizes = [8, 1], strides = [1, 1]} : vector<8x8xf32> to vector<8x1xf32>
    %7 = vector.broadcast %6 : vector<8x1xf32> to vector<8x128xf32>
    %8 = vector.broadcast %1 : vector<1x128xf32> to vector<8x128xf32>
    %9 = arith.mulf %7, %8 : vector<8x128xf32>
    %10 = vector.broadcast %2 : vector<1x128xf32> to vector<8x128xf32>
    %11 = arith.addf %9, %10 : vector<8x128xf32>
    %12 = vector.extract_strided_slice %0 {offsets = [0, 1], sizes = [8, 1], strides = [1, 1]} : vector<8x8xf32> to vector<8x1xf32>
    %13 = vector.broadcast %12 : vector<8x1xf32> to vector<8x128xf32>
    %14 = vector.broadcast %1 : vector<1x128xf32> to vector<8x128xf32>
    %15 = arith.mulf %13, %14 : vector<8x128xf32>
    %16 = vector.broadcast %2 : vector<1x128xf32> to vector<8x128xf32>
    %17 = arith.addf %15, %16 : vector<8x128xf32>
    %18 = vector.extract_strided_slice %0 {offsets = [0, 2], sizes = [8, 1], strides = [1, 1]} : vector<8x8xf32> to vector<8x1xf32>
    %19 = vector.broadcast %18 : vector<8x1xf32> to vector<8x128xf32>
    %20 = vector.broadcast %1 : vector<1x128xf32> to vector<8x128xf32>
    %21 = arith.mulf %19, %20 : vector<8x128xf32>
    %22 = vector.broadcast %2 : vector<1x128xf32> to vector<8x128xf32>
    %23 = arith.addf %21, %22 : vector<8x128xf32>
    %24 = vector.extract_strided_slice %0 {offsets = [0, 3], sizes = [8, 1], strides = [1, 1]} : vector<8x8xf32> to vector<8x1xf32>
    %25 = vector.broadcast %24 : vector<8x1xf32> to vector<8x128xf32>
    %26 = vector.broadcast %1 : vector<1x128xf32> to vector<8x128xf32>
    %27 = arith.mulf %25, %26 : vector<8x128xf32>
    %28 = vector.broadcast %2 : vector<1x128xf32> to vector<8x128xf32>
    %29 = arith.addf %27, %28 : vector<8x128xf32>
    %30 = vector.extract_strided_slice %0 {offsets = [0, 4], sizes = [8, 1], strides = [1, 1]} : vector<8x8xf32> to vector<8x1xf32>
    %31 = vector.broadcast %30 : vector<8x1xf32> to vector<8x128xf32>
    %32 = vector.broadcast %1 : vector<1x128xf32> to vector<8x128xf32>
    %33 = arith.mulf %31, %32 : vector<8x128xf32>
    %34 = vector.broadcast %2 : vector<1x128xf32> to vector<8x128xf32>
    %35 = arith.addf %33, %34 : vector<8x128xf32>
    %36 = vector.extract_strided_slice %0 {offsets = [0, 5], sizes = [8, 1], strides = [1, 1]} : vector<8x8xf32> to vector<8x1xf32>
    %37 = vector.broadcast %36 : vector<8x1xf32> to vector<8x128xf32>
    %38 = vector.broadcast %1 : vector<1x128xf32> to vector<8x128xf32>
    %39 = arith.mulf %37, %38 : vector<8x128xf32>
    %40 = vector.broadcast %2 : vector<1x128xf32> to vector<8x128xf32>
    %41 = arith.addf %39, %40 : vector<8x128xf32>
    %42 = vector.extract_strided_slice %0 {offsets = [0, 6], sizes = [8, 1], strides = [1, 1]} : vector<8x8xf32> to vector<8x1xf32>
    %43 = vector.broadcast %42 : vector<8x1xf32> to vector<8x128xf32>
    %44 = vector.broadcast %1 : vector<1x128xf32> to vector<8x128xf32>
    %45 = arith.mulf %43, %44 : vector<8x128xf32>
    %46 = vector.broadcast %2 : vector<1x128xf32> to vector<8x128xf32>
    %47 = arith.addf %45, %46 : vector<8x128xf32>
    %48 = vector.extract_strided_slice %0 {offsets = [0, 7], sizes = [8, 1], strides = [1, 1]} : vector<8x8xf32> to vector<8x1xf32>
    %49 = vector.broadcast %48 : vector<8x1xf32> to vector<8x128xf32>
    %50 = vector.broadcast %1 : vector<1x128xf32> to vector<8x128xf32>
    %51 = arith.mulf %49, %50 : vector<8x128xf32>
    %52 = vector.broadcast %2 : vector<1x128xf32> to vector<8x128xf32>
    %53 = arith.addf %51, %52 : vector<8x128xf32>
    %cst = arith.constant 0.000000e+00 : f32
    %54 = vector.broadcast %cst : f32 to vector<8x32xf32>
    %cst_11 = arith.constant 0.000000e+00 : f32
    %55 = vector.broadcast %cst_11 : f32 to vector<8x32xf32>
    %cst_12 = arith.constant 0.000000e+00 : f32
    %56 = vector.broadcast %cst_12 : f32 to vector<8x32xf32>
    %cst_13 = arith.constant 0.000000e+00 : f32
    %57 = vector.broadcast %cst_13 : f32 to vector<8x32xf32>
    %cst_14 = arith.constant 0.000000e+00 : f32
    %58 = vector.broadcast %cst_14 : f32 to vector<8x32xf32>
    %59 = arith.truncf %54 : vector<8x32xf32> to vector<8x32xbf16>
    %cst_15 = arith.constant dense<0.000000e+00> : vector<8x128xf32>
    %60 = tpu.matmul %59, %3, %cst_15 {dimension_numbers = #tpu.dot_dimension_numbers<[1], [0], [0], [1], [0, 0, 1, 1], [], []>} : vector<8x32xbf16>, vector<32x128xbf16>, vector<8x128xf32> -> vector<8x128xf32>
    %61 = arith.addf %11, %60 : vector<8x128xf32>
    %62 = arith.negf %61 : vector<8x128xf32>
    %63 = math.exp %62 : vector<8x128xf32>
    %cst_16 = arith.constant 1.000000e+00 : f32
    %64 = vector.broadcast %cst_16 : f32 to vector<8x128xf32>
    %65 = arith.addf %64, %63 : vector<8x128xf32>
    %66 = arith.divf %64, %65 : vector<8x128xf32>
    %67 = math.tanh %61 : vector<8x128xf32>
    %68 = vector.extract_strided_slice %66 {offsets = [0, 0], sizes = [8, 32], strides = [1, 1]} : vector<8x128xf32> to vector<8x32xf32>
    %69 = vector.extract_strided_slice %66 {offsets = [0, 32], sizes = [8, 32], strides = [1, 1]} : vector<8x128xf32> to vector<8x32xf32>
    %70 = vector.extract_strided_slice %67 {offsets = [0, 64], sizes = [8, 32], strides = [1, 1]} : vector<8x128xf32> to vector<8x32xf32>
    %71 = vector.extract_strided_slice %66 {offsets = [0, 96], sizes = [8, 32], strides = [1, 1]} : vector<8x128xf32> to vector<8x32xf32>
    %72 = arith.mulf %69, %55 : vector<8x32xf32>
    %73 = arith.mulf %68, %70 : vector<8x32xf32>
    %74 = arith.addf %72, %73 : vector<8x32xf32>
    %75 = math.tanh %74 : vector<8x32xf32>
    %76 = arith.mulf %71, %75 : vector<8x32xf32>
    %77 = tpu.concatenate %76, %56 in 1 : vector<8x32xf32>, vector<8x32xf32> -> vector<8x64xf32>
    %78 = arith.truncf %77 : vector<8x64xf32> to vector<8x64xbf16>
    %cst_17 = arith.constant dense<0.000000e+00> : vector<8x128xf32>
    %79 = tpu.matmul %78, %4, %cst_17 {dimension_numbers = #tpu.dot_dimension_numbers<[1], [0], [0], [1], [0, 0, 1, 1], [], []>} : vector<8x64xbf16>, vector<64x128xbf16>, vector<8x128xf32> -> vector<8x128xf32>
    %80 = vector.broadcast %5 : vector<1x128xf32> to vector<8x128xf32>
    %81 = arith.addf %79, %80 : vector<8x128xf32>
    %82 = arith.negf %81 : vector<8x128xf32>
    %83 = math.exp %82 : vector<8x128xf32>
    %cst_18 = arith.constant 1.000000e+00 : f32
    %84 = vector.broadcast %cst_18 : f32 to vector<8x128xf32>
    %85 = arith.addf %84, %83 : vector<8x128xf32>
    %86 = arith.divf %84, %85 : vector<8x128xf32>
    %87 = math.tanh %81 : vector<8x128xf32>
    %88 = vector.extract_strided_slice %86 {offsets = [0, 0], sizes = [8, 32], strides = [1, 1]} : vector<8x128xf32> to vector<8x32xf32>
    %89 = vector.extract_strided_slice %86 {offsets = [0, 32], sizes = [8, 32], strides = [1, 1]} : vector<8x128xf32> to vector<8x32xf32>
    %90 = vector.extract_strided_slice %87 {offsets = [0, 64], sizes = [8, 32], strides = [1, 1]} : vector<8x128xf32> to vector<8x32xf32>
    %91 = vector.extract_strided_slice %86 {offsets = [0, 96], sizes = [8, 32], strides = [1, 1]} : vector<8x128xf32> to vector<8x32xf32>
    %92 = arith.mulf %89, %57 : vector<8x32xf32>
    %93 = arith.mulf %88, %90 : vector<8x32xf32>
    %94 = arith.addf %92, %93 : vector<8x32xf32>
    %95 = math.tanh %94 : vector<8x32xf32>
    %96 = arith.mulf %91, %95 : vector<8x32xf32>
    %97 = arith.truncf %96 : vector<8x32xf32> to vector<8x32xbf16>
    %c0_19 = arith.constant 0 : index
    %c0_20 = arith.constant 0 : index
    %c0_21 = arith.constant 0 : index
    %98 = vector.load %arg6[%c0_19, %c0_20, %c0_21] : memref<8x32x32xbf16, #tpu.memory_space<vmem>>, vector<1x32x32xbf16>
    %99 = vector.shape_cast %98 : vector<1x32x32xbf16> to vector<32x32xbf16>
    %cst_22 = arith.constant dense<0.000000e+00> : vector<8x32xf32>
    %100 = tpu.matmul %97, %99, %cst_22 {dimension_numbers = #tpu.dot_dimension_numbers<[1], [0], [0], [1], [0, 0, 1, 1], [], []>} : vector<8x32xbf16>, vector<32x32xbf16>, vector<8x32xf32> -> vector<8x32xf32>
    %101 = arith.addf %58, %100 : vector<8x32xf32>
    %102 = arith.truncf %76 : vector<8x32xf32> to vector<8x32xbf16>
    %cst_23 = arith.constant dense<0.000000e+00> : vector<8x128xf32>
    %103 = tpu.matmul %102, %3, %cst_23 {dimension_numbers = #tpu.dot_dimension_numbers<[1], [0], [0], [1], [0, 0, 1, 1], [], []>} : vector<8x32xbf16>, vector<32x128xbf16>, vector<8x128xf32> -> vector<8x128xf32>
    %104 = arith.addf %17, %103 : vector<8x128xf32>
    %105 = arith.negf %104 : vector<8x128xf32>
    %106 = math.exp %105 : vector<8x128xf32>
    %cst_24 = arith.constant 1.000000e+00 : f32
    %107 = vector.broadcast %cst_24 : f32 to vector<8x128xf32>
    %108 = arith.addf %107, %106 : vector<8x128xf32>
    %109 = arith.divf %107, %108 : vector<8x128xf32>
    %110 = math.tanh %104 : vector<8x128xf32>
    %111 = vector.extract_strided_slice %109 {offsets = [0, 0], sizes = [8, 32], strides = [1, 1]} : vector<8x128xf32> to vector<8x32xf32>
    %112 = vector.extract_strided_slice %109 {offsets = [0, 32], sizes = [8, 32], strides = [1, 1]} : vector<8x128xf32> to vector<8x32xf32>
    %113 = vector.extract_strided_slice %110 {offsets = [0, 64], sizes = [8, 32], strides = [1, 1]} : vector<8x128xf32> to vector<8x32xf32>
    %114 = vector.extract_strided_slice %109 {offsets = [0, 96], sizes = [8, 32], strides = [1, 1]} : vector<8x128xf32> to vector<8x32xf32>
    %115 = arith.mulf %112, %74 : vector<8x32xf32>
    %116 = arith.mulf %111, %113 : vector<8x32xf32>
    %117 = arith.addf %115, %116 : vector<8x32xf32>
    %118 = math.tanh %117 : vector<8x32xf32>
    %119 = arith.mulf %114, %118 : vector<8x32xf32>
    %120 = tpu.concatenate %119, %96 in 1 : vector<8x32xf32>, vector<8x32xf32> -> vector<8x64xf32>
    %121 = arith.truncf %120 : vector<8x64xf32> to vector<8x64xbf16>
    %cst_25 = arith.constant dense<0.000000e+00> : vector<8x128xf32>
    %122 = tpu.matmul %121, %4, %cst_25 {dimension_numbers = #tpu.dot_dimension_numbers<[1], [0], [0], [1], [0, 0, 1, 1], [], []>} : vector<8x64xbf16>, vector<64x128xbf16>, vector<8x128xf32> -> vector<8x128xf32>
    %123 = vector.broadcast %5 : vector<1x128xf32> to vector<8x128xf32>
    %124 = arith.addf %122, %123 : vector<8x128xf32>
    %125 = arith.negf %124 : vector<8x128xf32>
    %126 = math.exp %125 : vector<8x128xf32>
    %cst_26 = arith.constant 1.000000e+00 : f32
    %127 = vector.broadcast %cst_26 : f32 to vector<8x128xf32>
    %128 = arith.addf %127, %126 : vector<8x128xf32>
    %129 = arith.divf %127, %128 : vector<8x128xf32>
    %130 = math.tanh %124 : vector<8x128xf32>
    %131 = vector.extract_strided_slice %129 {offsets = [0, 0], sizes = [8, 32], strides = [1, 1]} : vector<8x128xf32> to vector<8x32xf32>
    %132 = vector.extract_strided_slice %129 {offsets = [0, 32], sizes = [8, 32], strides = [1, 1]} : vector<8x128xf32> to vector<8x32xf32>
    %133 = vector.extract_strided_slice %130 {offsets = [0, 64], sizes = [8, 32], strides = [1, 1]} : vector<8x128xf32> to vector<8x32xf32>
    %134 = vector.extract_strided_slice %129 {offsets = [0, 96], sizes = [8, 32], strides = [1, 1]} : vector<8x128xf32> to vector<8x32xf32>
    %135 = arith.mulf %132, %94 : vector<8x32xf32>
    %136 = arith.mulf %131, %133 : vector<8x32xf32>
    %137 = arith.addf %135, %136 : vector<8x32xf32>
    %138 = math.tanh %137 : vector<8x32xf32>
    %139 = arith.mulf %134, %138 : vector<8x32xf32>
    %140 = arith.truncf %139 : vector<8x32xf32> to vector<8x32xbf16>
    %c1 = arith.constant 1 : index
    %c0_27 = arith.constant 0 : index
    %c0_28 = arith.constant 0 : index
    %141 = vector.load %arg6[%c1, %c0_27, %c0_28] : memref<8x32x32xbf16, #tpu.memory_space<vmem>>, vector<1x32x32xbf16>
    %142 = vector.shape_cast %141 : vector<1x32x32xbf16> to vector<32x32xbf16>
    %cst_29 = arith.constant dense<0.000000e+00> : vector<8x32xf32>
    %143 = tpu.matmul %140, %142, %cst_29 {dimension_numbers = #tpu.dot_dimension_numbers<[1], [0], [0], [1], [0, 0, 1, 1], [], []>} : vector<8x32xbf16>, vector<32x32xbf16>, vector<8x32xf32> -> vector<8x32xf32>
    %144 = arith.addf %101, %143 : vector<8x32xf32>
    %145 = arith.truncf %119 : vector<8x32xf32> to vector<8x32xbf16>
    %cst_30 = arith.constant dense<0.000000e+00> : vector<8x128xf32>
    %146 = tpu.matmul %145, %3, %cst_30 {dimension_numbers = #tpu.dot_dimension_numbers<[1], [0], [0], [1], [0, 0, 1, 1], [], []>} : vector<8x32xbf16>, vector<32x128xbf16>, vector<8x128xf32> -> vector<8x128xf32>
    %147 = arith.addf %23, %146 : vector<8x128xf32>
    %148 = arith.negf %147 : vector<8x128xf32>
    %149 = math.exp %148 : vector<8x128xf32>
    %cst_31 = arith.constant 1.000000e+00 : f32
    %150 = vector.broadcast %cst_31 : f32 to vector<8x128xf32>
    %151 = arith.addf %150, %149 : vector<8x128xf32>
    %152 = arith.divf %150, %151 : vector<8x128xf32>
    %153 = math.tanh %147 : vector<8x128xf32>
    %154 = vector.extract_strided_slice %152 {offsets = [0, 0], sizes = [8, 32], strides = [1, 1]} : vector<8x128xf32> to vector<8x32xf32>
    %155 = vector.extract_strided_slice %152 {offsets = [0, 32], sizes = [8, 32], strides = [1, 1]} : vector<8x128xf32> to vector<8x32xf32>
    %156 = vector.extract_strided_slice %153 {offsets = [0, 64], sizes = [8, 32], strides = [1, 1]} : vector<8x128xf32> to vector<8x32xf32>
    %157 = vector.extract_strided_slice %152 {offsets = [0, 96], sizes = [8, 32], strides = [1, 1]} : vector<8x128xf32> to vector<8x32xf32>
    %158 = arith.mulf %155, %117 : vector<8x32xf32>
    %159 = arith.mulf %154, %156 : vector<8x32xf32>
    %160 = arith.addf %158, %159 : vector<8x32xf32>
    %161 = math.tanh %160 : vector<8x32xf32>
    %162 = arith.mulf %157, %161 : vector<8x32xf32>
    %163 = tpu.concatenate %162, %139 in 1 : vector<8x32xf32>, vector<8x32xf32> -> vector<8x64xf32>
    %164 = arith.truncf %163 : vector<8x64xf32> to vector<8x64xbf16>
    %cst_32 = arith.constant dense<0.000000e+00> : vector<8x128xf32>
    %165 = tpu.matmul %164, %4, %cst_32 {dimension_numbers = #tpu.dot_dimension_numbers<[1], [0], [0], [1], [0, 0, 1, 1], [], []>} : vector<8x64xbf16>, vector<64x128xbf16>, vector<8x128xf32> -> vector<8x128xf32>
    %166 = vector.broadcast %5 : vector<1x128xf32> to vector<8x128xf32>
    %167 = arith.addf %165, %166 : vector<8x128xf32>
    %168 = arith.negf %167 : vector<8x128xf32>
    %169 = math.exp %168 : vector<8x128xf32>
    %cst_33 = arith.constant 1.000000e+00 : f32
    %170 = vector.broadcast %cst_33 : f32 to vector<8x128xf32>
    %171 = arith.addf %170, %169 : vector<8x128xf32>
    %172 = arith.divf %170, %171 : vector<8x128xf32>
    %173 = math.tanh %167 : vector<8x128xf32>
    %174 = vector.extract_strided_slice %172 {offsets = [0, 0], sizes = [8, 32], strides = [1, 1]} : vector<8x128xf32> to vector<8x32xf32>
    %175 = vector.extract_strided_slice %172 {offsets = [0, 32], sizes = [8, 32], strides = [1, 1]} : vector<8x128xf32> to vector<8x32xf32>
    %176 = vector.extract_strided_slice %173 {offsets = [0, 64], sizes = [8, 32], strides = [1, 1]} : vector<8x128xf32> to vector<8x32xf32>
    %177 = vector.extract_strided_slice %172 {offsets = [0, 96], sizes = [8, 32], strides = [1, 1]} : vector<8x128xf32> to vector<8x32xf32>
    %178 = arith.mulf %175, %137 : vector<8x32xf32>
    %179 = arith.mulf %174, %176 : vector<8x32xf32>
    %180 = arith.addf %178, %179 : vector<8x32xf32>
    %181 = math.tanh %180 : vector<8x32xf32>
    %182 = arith.mulf %177, %181 : vector<8x32xf32>
    %183 = arith.truncf %182 : vector<8x32xf32> to vector<8x32xbf16>
    %c2 = arith.constant 2 : index
    %c0_34 = arith.constant 0 : index
    %c0_35 = arith.constant 0 : index
    %184 = vector.load %arg6[%c2, %c0_34, %c0_35] : memref<8x32x32xbf16, #tpu.memory_space<vmem>>, vector<1x32x32xbf16>
    %185 = vector.shape_cast %184 : vector<1x32x32xbf16> to vector<32x32xbf16>
    %cst_36 = arith.constant dense<0.000000e+00> : vector<8x32xf32>
    %186 = tpu.matmul %183, %185, %cst_36 {dimension_numbers = #tpu.dot_dimension_numbers<[1], [0], [0], [1], [0, 0, 1, 1], [], []>} : vector<8x32xbf16>, vector<32x32xbf16>, vector<8x32xf32> -> vector<8x32xf32>
    %187 = arith.addf %144, %186 : vector<8x32xf32>
    %188 = arith.truncf %162 : vector<8x32xf32> to vector<8x32xbf16>
    %cst_37 = arith.constant dense<0.000000e+00> : vector<8x128xf32>
    %189 = tpu.matmul %188, %3, %cst_37 {dimension_numbers = #tpu.dot_dimension_numbers<[1], [0], [0], [1], [0, 0, 1, 1], [], []>} : vector<8x32xbf16>, vector<32x128xbf16>, vector<8x128xf32> -> vector<8x128xf32>
    %190 = arith.addf %29, %189 : vector<8x128xf32>
    %191 = arith.negf %190 : vector<8x128xf32>
    %192 = math.exp %191 : vector<8x128xf32>
    %cst_38 = arith.constant 1.000000e+00 : f32
    %193 = vector.broadcast %cst_38 : f32 to vector<8x128xf32>
    %194 = arith.addf %193, %192 : vector<8x128xf32>
    %195 = arith.divf %193, %194 : vector<8x128xf32>
    %196 = math.tanh %190 : vector<8x128xf32>
    %197 = vector.extract_strided_slice %195 {offsets = [0, 0], sizes = [8, 32], strides = [1, 1]} : vector<8x128xf32> to vector<8x32xf32>
    %198 = vector.extract_strided_slice %195 {offsets = [0, 32], sizes = [8, 32], strides = [1, 1]} : vector<8x128xf32> to vector<8x32xf32>
    %199 = vector.extract_strided_slice %196 {offsets = [0, 64], sizes = [8, 32], strides = [1, 1]} : vector<8x128xf32> to vector<8x32xf32>
    %200 = vector.extract_strided_slice %195 {offsets = [0, 96], sizes = [8, 32], strides = [1, 1]} : vector<8x128xf32> to vector<8x32xf32>
    %201 = arith.mulf %198, %160 : vector<8x32xf32>
    %202 = arith.mulf %197, %199 : vector<8x32xf32>
    %203 = arith.addf %201, %202 : vector<8x32xf32>
    %204 = math.tanh %203 : vector<8x32xf32>
    %205 = arith.mulf %200, %204 : vector<8x32xf32>
    %206 = tpu.concatenate %205, %182 in 1 : vector<8x32xf32>, vector<8x32xf32> -> vector<8x64xf32>
    %207 = arith.truncf %206 : vector<8x64xf32> to vector<8x64xbf16>
    %cst_39 = arith.constant dense<0.000000e+00> : vector<8x128xf32>
    %208 = tpu.matmul %207, %4, %cst_39 {dimension_numbers = #tpu.dot_dimension_numbers<[1], [0], [0], [1], [0, 0, 1, 1], [], []>} : vector<8x64xbf16>, vector<64x128xbf16>, vector<8x128xf32> -> vector<8x128xf32>
    %209 = vector.broadcast %5 : vector<1x128xf32> to vector<8x128xf32>
    %210 = arith.addf %208, %209 : vector<8x128xf32>
    %211 = arith.negf %210 : vector<8x128xf32>
    %212 = math.exp %211 : vector<8x128xf32>
    %cst_40 = arith.constant 1.000000e+00 : f32
    %213 = vector.broadcast %cst_40 : f32 to vector<8x128xf32>
    %214 = arith.addf %213, %212 : vector<8x128xf32>
    %215 = arith.divf %213, %214 : vector<8x128xf32>
    %216 = math.tanh %210 : vector<8x128xf32>
    %217 = vector.extract_strided_slice %215 {offsets = [0, 0], sizes = [8, 32], strides = [1, 1]} : vector<8x128xf32> to vector<8x32xf32>
    %218 = vector.extract_strided_slice %215 {offsets = [0, 32], sizes = [8, 32], strides = [1, 1]} : vector<8x128xf32> to vector<8x32xf32>
    %219 = vector.extract_strided_slice %216 {offsets = [0, 64], sizes = [8, 32], strides = [1, 1]} : vector<8x128xf32> to vector<8x32xf32>
    %220 = vector.extract_strided_slice %215 {offsets = [0, 96], sizes = [8, 32], strides = [1, 1]} : vector<8x128xf32> to vector<8x32xf32>
    %221 = arith.mulf %218, %180 : vector<8x32xf32>
    %222 = arith.mulf %217, %219 : vector<8x32xf32>
    %223 = arith.addf %221, %222 : vector<8x32xf32>
    %224 = math.tanh %223 : vector<8x32xf32>
    %225 = arith.mulf %220, %224 : vector<8x32xf32>
    %226 = arith.truncf %225 : vector<8x32xf32> to vector<8x32xbf16>
    %c3 = arith.constant 3 : index
    %c0_41 = arith.constant 0 : index
    %c0_42 = arith.constant 0 : index
    %227 = vector.load %arg6[%c3, %c0_41, %c0_42] : memref<8x32x32xbf16, #tpu.memory_space<vmem>>, vector<1x32x32xbf16>
    %228 = vector.shape_cast %227 : vector<1x32x32xbf16> to vector<32x32xbf16>
    %cst_43 = arith.constant dense<0.000000e+00> : vector<8x32xf32>
    %229 = tpu.matmul %226, %228, %cst_43 {dimension_numbers = #tpu.dot_dimension_numbers<[1], [0], [0], [1], [0, 0, 1, 1], [], []>} : vector<8x32xbf16>, vector<32x32xbf16>, vector<8x32xf32> -> vector<8x32xf32>
    %230 = arith.addf %187, %229 : vector<8x32xf32>
    %231 = arith.truncf %205 : vector<8x32xf32> to vector<8x32xbf16>
    %cst_44 = arith.constant dense<0.000000e+00> : vector<8x128xf32>
    %232 = tpu.matmul %231, %3, %cst_44 {dimension_numbers = #tpu.dot_dimension_numbers<[1], [0], [0], [1], [0, 0, 1, 1], [], []>} : vector<8x32xbf16>, vector<32x128xbf16>, vector<8x128xf32> -> vector<8x128xf32>
    %233 = arith.addf %35, %232 : vector<8x128xf32>
    %234 = arith.negf %233 : vector<8x128xf32>
    %235 = math.exp %234 : vector<8x128xf32>
    %cst_45 = arith.constant 1.000000e+00 : f32
    %236 = vector.broadcast %cst_45 : f32 to vector<8x128xf32>
    %237 = arith.addf %236, %235 : vector<8x128xf32>
    %238 = arith.divf %236, %237 : vector<8x128xf32>
    %239 = math.tanh %233 : vector<8x128xf32>
    %240 = vector.extract_strided_slice %238 {offsets = [0, 0], sizes = [8, 32], strides = [1, 1]} : vector<8x128xf32> to vector<8x32xf32>
    %241 = vector.extract_strided_slice %238 {offsets = [0, 32], sizes = [8, 32], strides = [1, 1]} : vector<8x128xf32> to vector<8x32xf32>
    %242 = vector.extract_strided_slice %239 {offsets = [0, 64], sizes = [8, 32], strides = [1, 1]} : vector<8x128xf32> to vector<8x32xf32>
    %243 = vector.extract_strided_slice %238 {offsets = [0, 96], sizes = [8, 32], strides = [1, 1]} : vector<8x128xf32> to vector<8x32xf32>
    %244 = arith.mulf %241, %203 : vector<8x32xf32>
    %245 = arith.mulf %240, %242 : vector<8x32xf32>
    %246 = arith.addf %244, %245 : vector<8x32xf32>
    %247 = math.tanh %246 : vector<8x32xf32>
    %248 = arith.mulf %243, %247 : vector<8x32xf32>
    %249 = tpu.concatenate %248, %225 in 1 : vector<8x32xf32>, vector<8x32xf32> -> vector<8x64xf32>
    %250 = arith.truncf %249 : vector<8x64xf32> to vector<8x64xbf16>
    %cst_46 = arith.constant dense<0.000000e+00> : vector<8x128xf32>
    %251 = tpu.matmul %250, %4, %cst_46 {dimension_numbers = #tpu.dot_dimension_numbers<[1], [0], [0], [1], [0, 0, 1, 1], [], []>} : vector<8x64xbf16>, vector<64x128xbf16>, vector<8x128xf32> -> vector<8x128xf32>
    %252 = vector.broadcast %5 : vector<1x128xf32> to vector<8x128xf32>
    %253 = arith.addf %251, %252 : vector<8x128xf32>
    %254 = arith.negf %253 : vector<8x128xf32>
    %255 = math.exp %254 : vector<8x128xf32>
    %cst_47 = arith.constant 1.000000e+00 : f32
    %256 = vector.broadcast %cst_47 : f32 to vector<8x128xf32>
    %257 = arith.addf %256, %255 : vector<8x128xf32>
    %258 = arith.divf %256, %257 : vector<8x128xf32>
    %259 = math.tanh %253 : vector<8x128xf32>
    %260 = vector.extract_strided_slice %258 {offsets = [0, 0], sizes = [8, 32], strides = [1, 1]} : vector<8x128xf32> to vector<8x32xf32>
    %261 = vector.extract_strided_slice %258 {offsets = [0, 32], sizes = [8, 32], strides = [1, 1]} : vector<8x128xf32> to vector<8x32xf32>
    %262 = vector.extract_strided_slice %259 {offsets = [0, 64], sizes = [8, 32], strides = [1, 1]} : vector<8x128xf32> to vector<8x32xf32>
    %263 = vector.extract_strided_slice %258 {offsets = [0, 96], sizes = [8, 32], strides = [1, 1]} : vector<8x128xf32> to vector<8x32xf32>
    %264 = arith.mulf %261, %223 : vector<8x32xf32>
    %265 = arith.mulf %260, %262 : vector<8x32xf32>
    %266 = arith.addf %264, %265 : vector<8x32xf32>
    %267 = math.tanh %266 : vector<8x32xf32>
    %268 = arith.mulf %263, %267 : vector<8x32xf32>
    %269 = arith.truncf %268 : vector<8x32xf32> to vector<8x32xbf16>
    %c4 = arith.constant 4 : index
    %c0_48 = arith.constant 0 : index
    %c0_49 = arith.constant 0 : index
    %270 = vector.load %arg6[%c4, %c0_48, %c0_49] : memref<8x32x32xbf16, #tpu.memory_space<vmem>>, vector<1x32x32xbf16>
    %271 = vector.shape_cast %270 : vector<1x32x32xbf16> to vector<32x32xbf16>
    %cst_50 = arith.constant dense<0.000000e+00> : vector<8x32xf32>
    %272 = tpu.matmul %269, %271, %cst_50 {dimension_numbers = #tpu.dot_dimension_numbers<[1], [0], [0], [1], [0, 0, 1, 1], [], []>} : vector<8x32xbf16>, vector<32x32xbf16>, vector<8x32xf32> -> vector<8x32xf32>
    %273 = arith.addf %230, %272 : vector<8x32xf32>
    %274 = arith.truncf %248 : vector<8x32xf32> to vector<8x32xbf16>
    %cst_51 = arith.constant dense<0.000000e+00> : vector<8x128xf32>
    %275 = tpu.matmul %274, %3, %cst_51 {dimension_numbers = #tpu.dot_dimension_numbers<[1], [0], [0], [1], [0, 0, 1, 1], [], []>} : vector<8x32xbf16>, vector<32x128xbf16>, vector<8x128xf32> -> vector<8x128xf32>
    %276 = arith.addf %41, %275 : vector<8x128xf32>
    %277 = arith.negf %276 : vector<8x128xf32>
    %278 = math.exp %277 : vector<8x128xf32>
    %cst_52 = arith.constant 1.000000e+00 : f32
    %279 = vector.broadcast %cst_52 : f32 to vector<8x128xf32>
    %280 = arith.addf %279, %278 : vector<8x128xf32>
    %281 = arith.divf %279, %280 : vector<8x128xf32>
    %282 = math.tanh %276 : vector<8x128xf32>
    %283 = vector.extract_strided_slice %281 {offsets = [0, 0], sizes = [8, 32], strides = [1, 1]} : vector<8x128xf32> to vector<8x32xf32>
    %284 = vector.extract_strided_slice %281 {offsets = [0, 32], sizes = [8, 32], strides = [1, 1]} : vector<8x128xf32> to vector<8x32xf32>
    %285 = vector.extract_strided_slice %282 {offsets = [0, 64], sizes = [8, 32], strides = [1, 1]} : vector<8x128xf32> to vector<8x32xf32>
    %286 = vector.extract_strided_slice %281 {offsets = [0, 96], sizes = [8, 32], strides = [1, 1]} : vector<8x128xf32> to vector<8x32xf32>
    %287 = arith.mulf %284, %246 : vector<8x32xf32>
    %288 = arith.mulf %283, %285 : vector<8x32xf32>
    %289 = arith.addf %287, %288 : vector<8x32xf32>
    %290 = math.tanh %289 : vector<8x32xf32>
    %291 = arith.mulf %286, %290 : vector<8x32xf32>
    %292 = tpu.concatenate %291, %268 in 1 : vector<8x32xf32>, vector<8x32xf32> -> vector<8x64xf32>
    %293 = arith.truncf %292 : vector<8x64xf32> to vector<8x64xbf16>
    %cst_53 = arith.constant dense<0.000000e+00> : vector<8x128xf32>
    %294 = tpu.matmul %293, %4, %cst_53 {dimension_numbers = #tpu.dot_dimension_numbers<[1], [0], [0], [1], [0, 0, 1, 1], [], []>} : vector<8x64xbf16>, vector<64x128xbf16>, vector<8x128xf32> -> vector<8x128xf32>
    %295 = vector.broadcast %5 : vector<1x128xf32> to vector<8x128xf32>
    %296 = arith.addf %294, %295 : vector<8x128xf32>
    %297 = arith.negf %296 : vector<8x128xf32>
    %298 = math.exp %297 : vector<8x128xf32>
    %cst_54 = arith.constant 1.000000e+00 : f32
    %299 = vector.broadcast %cst_54 : f32 to vector<8x128xf32>
    %300 = arith.addf %299, %298 : vector<8x128xf32>
    %301 = arith.divf %299, %300 : vector<8x128xf32>
    %302 = math.tanh %296 : vector<8x128xf32>
    %303 = vector.extract_strided_slice %301 {offsets = [0, 0], sizes = [8, 32], strides = [1, 1]} : vector<8x128xf32> to vector<8x32xf32>
    %304 = vector.extract_strided_slice %301 {offsets = [0, 32], sizes = [8, 32], strides = [1, 1]} : vector<8x128xf32> to vector<8x32xf32>
    %305 = vector.extract_strided_slice %302 {offsets = [0, 64], sizes = [8, 32], strides = [1, 1]} : vector<8x128xf32> to vector<8x32xf32>
    %306 = vector.extract_strided_slice %301 {offsets = [0, 96], sizes = [8, 32], strides = [1, 1]} : vector<8x128xf32> to vector<8x32xf32>
    %307 = arith.mulf %304, %266 : vector<8x32xf32>
    %308 = arith.mulf %303, %305 : vector<8x32xf32>
    %309 = arith.addf %307, %308 : vector<8x32xf32>
    %310 = math.tanh %309 : vector<8x32xf32>
    %311 = arith.mulf %306, %310 : vector<8x32xf32>
    %312 = arith.truncf %311 : vector<8x32xf32> to vector<8x32xbf16>
    %c5 = arith.constant 5 : index
    %c0_55 = arith.constant 0 : index
    %c0_56 = arith.constant 0 : index
    %313 = vector.load %arg6[%c5, %c0_55, %c0_56] : memref<8x32x32xbf16, #tpu.memory_space<vmem>>, vector<1x32x32xbf16>
    %314 = vector.shape_cast %313 : vector<1x32x32xbf16> to vector<32x32xbf16>
    %cst_57 = arith.constant dense<0.000000e+00> : vector<8x32xf32>
    %315 = tpu.matmul %312, %314, %cst_57 {dimension_numbers = #tpu.dot_dimension_numbers<[1], [0], [0], [1], [0, 0, 1, 1], [], []>} : vector<8x32xbf16>, vector<32x32xbf16>, vector<8x32xf32> -> vector<8x32xf32>
    %316 = arith.addf %273, %315 : vector<8x32xf32>
    %317 = arith.truncf %291 : vector<8x32xf32> to vector<8x32xbf16>
    %cst_58 = arith.constant dense<0.000000e+00> : vector<8x128xf32>
    %318 = tpu.matmul %317, %3, %cst_58 {dimension_numbers = #tpu.dot_dimension_numbers<[1], [0], [0], [1], [0, 0, 1, 1], [], []>} : vector<8x32xbf16>, vector<32x128xbf16>, vector<8x128xf32> -> vector<8x128xf32>
    %319 = arith.addf %47, %318 : vector<8x128xf32>
    %320 = arith.negf %319 : vector<8x128xf32>
    %321 = math.exp %320 : vector<8x128xf32>
    %cst_59 = arith.constant 1.000000e+00 : f32
    %322 = vector.broadcast %cst_59 : f32 to vector<8x128xf32>
    %323 = arith.addf %322, %321 : vector<8x128xf32>
    %324 = arith.divf %322, %323 : vector<8x128xf32>
    %325 = math.tanh %319 : vector<8x128xf32>
    %326 = vector.extract_strided_slice %324 {offsets = [0, 0], sizes = [8, 32], strides = [1, 1]} : vector<8x128xf32> to vector<8x32xf32>
    %327 = vector.extract_strided_slice %324 {offsets = [0, 32], sizes = [8, 32], strides = [1, 1]} : vector<8x128xf32> to vector<8x32xf32>
    %328 = vector.extract_strided_slice %325 {offsets = [0, 64], sizes = [8, 32], strides = [1, 1]} : vector<8x128xf32> to vector<8x32xf32>
    %329 = vector.extract_strided_slice %324 {offsets = [0, 96], sizes = [8, 32], strides = [1, 1]} : vector<8x128xf32> to vector<8x32xf32>
    %330 = arith.mulf %327, %289 : vector<8x32xf32>
    %331 = arith.mulf %326, %328 : vector<8x32xf32>
    %332 = arith.addf %330, %331 : vector<8x32xf32>
    %333 = math.tanh %332 : vector<8x32xf32>
    %334 = arith.mulf %329, %333 : vector<8x32xf32>
    %335 = tpu.concatenate %334, %311 in 1 : vector<8x32xf32>, vector<8x32xf32> -> vector<8x64xf32>
    %336 = arith.truncf %335 : vector<8x64xf32> to vector<8x64xbf16>
    %cst_60 = arith.constant dense<0.000000e+00> : vector<8x128xf32>
    %337 = tpu.matmul %336, %4, %cst_60 {dimension_numbers = #tpu.dot_dimension_numbers<[1], [0], [0], [1], [0, 0, 1, 1], [], []>} : vector<8x64xbf16>, vector<64x128xbf16>, vector<8x128xf32> -> vector<8x128xf32>
    %338 = vector.broadcast %5 : vector<1x128xf32> to vector<8x128xf32>
    %339 = arith.addf %337, %338 : vector<8x128xf32>
    %340 = arith.negf %339 : vector<8x128xf32>
    %341 = math.exp %340 : vector<8x128xf32>
    %cst_61 = arith.constant 1.000000e+00 : f32
    %342 = vector.broadcast %cst_61 : f32 to vector<8x128xf32>
    %343 = arith.addf %342, %341 : vector<8x128xf32>
    %344 = arith.divf %342, %343 : vector<8x128xf32>
    %345 = math.tanh %339 : vector<8x128xf32>
    %346 = vector.extract_strided_slice %344 {offsets = [0, 0], sizes = [8, 32], strides = [1, 1]} : vector<8x128xf32> to vector<8x32xf32>
    %347 = vector.extract_strided_slice %344 {offsets = [0, 32], sizes = [8, 32], strides = [1, 1]} : vector<8x128xf32> to vector<8x32xf32>
    %348 = vector.extract_strided_slice %345 {offsets = [0, 64], sizes = [8, 32], strides = [1, 1]} : vector<8x128xf32> to vector<8x32xf32>
    %349 = vector.extract_strided_slice %344 {offsets = [0, 96], sizes = [8, 32], strides = [1, 1]} : vector<8x128xf32> to vector<8x32xf32>
    %350 = arith.mulf %347, %309 : vector<8x32xf32>
    %351 = arith.mulf %346, %348 : vector<8x32xf32>
    %352 = arith.addf %350, %351 : vector<8x32xf32>
    %353 = math.tanh %352 : vector<8x32xf32>
    %354 = arith.mulf %349, %353 : vector<8x32xf32>
    %355 = arith.truncf %354 : vector<8x32xf32> to vector<8x32xbf16>
    %c6 = arith.constant 6 : index
    %c0_62 = arith.constant 0 : index
    %c0_63 = arith.constant 0 : index
    %356 = vector.load %arg6[%c6, %c0_62, %c0_63] : memref<8x32x32xbf16, #tpu.memory_space<vmem>>, vector<1x32x32xbf16>
    %357 = vector.shape_cast %356 : vector<1x32x32xbf16> to vector<32x32xbf16>
    %cst_64 = arith.constant dense<0.000000e+00> : vector<8x32xf32>
    %358 = tpu.matmul %355, %357, %cst_64 {dimension_numbers = #tpu.dot_dimension_numbers<[1], [0], [0], [1], [0, 0, 1, 1], [], []>} : vector<8x32xbf16>, vector<32x32xbf16>, vector<8x32xf32> -> vector<8x32xf32>
    %359 = arith.addf %316, %358 : vector<8x32xf32>
    %360 = arith.truncf %334 : vector<8x32xf32> to vector<8x32xbf16>
    %cst_65 = arith.constant dense<0.000000e+00> : vector<8x128xf32>
    %361 = tpu.matmul %360, %3, %cst_65 {dimension_numbers = #tpu.dot_dimension_numbers<[1], [0], [0], [1], [0, 0, 1, 1], [], []>} : vector<8x32xbf16>, vector<32x128xbf16>, vector<8x128xf32> -> vector<8x128xf32>
    %362 = arith.addf %53, %361 : vector<8x128xf32>
    %363 = arith.negf %362 : vector<8x128xf32>
    %364 = math.exp %363 : vector<8x128xf32>
    %cst_66 = arith.constant 1.000000e+00 : f32
    %365 = vector.broadcast %cst_66 : f32 to vector<8x128xf32>
    %366 = arith.addf %365, %364 : vector<8x128xf32>
    %367 = arith.divf %365, %366 : vector<8x128xf32>
    %368 = math.tanh %362 : vector<8x128xf32>
    %369 = vector.extract_strided_slice %367 {offsets = [0, 0], sizes = [8, 32], strides = [1, 1]} : vector<8x128xf32> to vector<8x32xf32>
    %370 = vector.extract_strided_slice %367 {offsets = [0, 32], sizes = [8, 32], strides = [1, 1]} : vector<8x128xf32> to vector<8x32xf32>
    %371 = vector.extract_strided_slice %368 {offsets = [0, 64], sizes = [8, 32], strides = [1, 1]} : vector<8x128xf32> to vector<8x32xf32>
    %372 = vector.extract_strided_slice %367 {offsets = [0, 96], sizes = [8, 32], strides = [1, 1]} : vector<8x128xf32> to vector<8x32xf32>
    %373 = arith.mulf %370, %332 : vector<8x32xf32>
    %374 = arith.mulf %369, %371 : vector<8x32xf32>
    %375 = arith.addf %373, %374 : vector<8x32xf32>
    %376 = math.tanh %375 : vector<8x32xf32>
    %377 = arith.mulf %372, %376 : vector<8x32xf32>
    %378 = tpu.concatenate %377, %354 in 1 : vector<8x32xf32>, vector<8x32xf32> -> vector<8x64xf32>
    %379 = arith.truncf %378 : vector<8x64xf32> to vector<8x64xbf16>
    %cst_67 = arith.constant dense<0.000000e+00> : vector<8x128xf32>
    %380 = tpu.matmul %379, %4, %cst_67 {dimension_numbers = #tpu.dot_dimension_numbers<[1], [0], [0], [1], [0, 0, 1, 1], [], []>} : vector<8x64xbf16>, vector<64x128xbf16>, vector<8x128xf32> -> vector<8x128xf32>
    %381 = vector.broadcast %5 : vector<1x128xf32> to vector<8x128xf32>
    %382 = arith.addf %380, %381 : vector<8x128xf32>
    %383 = arith.negf %382 : vector<8x128xf32>
    %384 = math.exp %383 : vector<8x128xf32>
    %cst_68 = arith.constant 1.000000e+00 : f32
    %385 = vector.broadcast %cst_68 : f32 to vector<8x128xf32>
    %386 = arith.addf %385, %384 : vector<8x128xf32>
    %387 = arith.divf %385, %386 : vector<8x128xf32>
    %388 = math.tanh %382 : vector<8x128xf32>
    %389 = vector.extract_strided_slice %387 {offsets = [0, 0], sizes = [8, 32], strides = [1, 1]} : vector<8x128xf32> to vector<8x32xf32>
    %390 = vector.extract_strided_slice %387 {offsets = [0, 32], sizes = [8, 32], strides = [1, 1]} : vector<8x128xf32> to vector<8x32xf32>
    %391 = vector.extract_strided_slice %388 {offsets = [0, 64], sizes = [8, 32], strides = [1, 1]} : vector<8x128xf32> to vector<8x32xf32>
    %392 = vector.extract_strided_slice %387 {offsets = [0, 96], sizes = [8, 32], strides = [1, 1]} : vector<8x128xf32> to vector<8x32xf32>
    %393 = arith.mulf %390, %352 : vector<8x32xf32>
    %394 = arith.mulf %389, %391 : vector<8x32xf32>
    %395 = arith.addf %393, %394 : vector<8x32xf32>
    %396 = math.tanh %395 : vector<8x32xf32>
    %397 = arith.mulf %392, %396 : vector<8x32xf32>
    %398 = arith.truncf %397 : vector<8x32xf32> to vector<8x32xbf16>
    %c7 = arith.constant 7 : index
    %c0_69 = arith.constant 0 : index
    %c0_70 = arith.constant 0 : index
    %399 = vector.load %arg6[%c7, %c0_69, %c0_70] : memref<8x32x32xbf16, #tpu.memory_space<vmem>>, vector<1x32x32xbf16>
    %400 = vector.shape_cast %399 : vector<1x32x32xbf16> to vector<32x32xbf16>
    %cst_71 = arith.constant dense<0.000000e+00> : vector<8x32xf32>
    %401 = tpu.matmul %398, %400, %cst_71 {dimension_numbers = #tpu.dot_dimension_numbers<[1], [0], [0], [1], [0, 0, 1, 1], [], []>} : vector<8x32xbf16>, vector<32x32xbf16>, vector<8x32xf32> -> vector<8x32xf32>
    %402 = arith.addf %359, %401 : vector<8x32xf32>
    %c0_72 = arith.constant 0 : index
    %c0_73 = arith.constant 0 : index
    %403 = vector.load %arg7[%c0_72, %c0_73] : memref<1x32xf32, #tpu.memory_space<vmem>>, vector<1x32xf32>
    %404 = vector.broadcast %403 : vector<1x32xf32> to vector<8x32xf32>
    %405 = arith.addf %402, %404 : vector<8x32xf32>
    %cst_74 = arith.constant 0.000000e+00 : f32
    %406 = vector.broadcast %cst_74 : f32 to vector<8x32xf32>
    %407 = arith.maximumf %405, %406 : vector<8x32xf32>
    %408 = arith.truncf %407 : vector<8x32xf32> to vector<8x32xbf16>
    %c0_75 = arith.constant 0 : index
    %c0_76 = arith.constant 0 : index
    %c0_77 = arith.constant 0 : index
    %409 = vector.load %arg8[%c0_75, %c0_76, %c0_77] : memref<9x32x32xbf16, #tpu.memory_space<vmem>>, vector<1x32x32xbf16>
    %410 = vector.shape_cast %409 : vector<1x32x32xbf16> to vector<32x32xbf16>
    %cst_78 = arith.constant dense<0.000000e+00> : vector<8x32xf32>
    %411 = tpu.matmul %408, %410, %cst_78 {dimension_numbers = #tpu.dot_dimension_numbers<[1], [0], [0], [1], [0, 0, 1, 1], [], []>} : vector<8x32xbf16>, vector<32x32xbf16>, vector<8x32xf32> -> vector<8x32xf32>
    %c0_79 = arith.constant 0 : index
    %c0_80 = arith.constant 0 : index
    %c0_81 = arith.constant 0 : index
    %412 = vector.load %arg9[%c0_79, %c0_80, %c0_81] : memref<9x1x32xf32, #tpu.memory_space<vmem>>, vector<1x1x32xf32>
    %413 = vector.shape_cast %412 : vector<1x1x32xf32> to vector<1x32xf32>
    %414 = vector.broadcast %413 : vector<1x32xf32> to vector<8x32xf32>
    %415 = arith.addf %411, %414 : vector<8x32xf32>
    %cst_82 = arith.constant 0.000000e+00 : f32
    %416 = vector.broadcast %cst_82 : f32 to vector<8x32xf32>
    %417 = arith.maximumf %415, %416 : vector<8x32xf32>
    %418 = arith.truncf %417 : vector<8x32xf32> to vector<8x32xbf16>
    %c1_83 = arith.constant 1 : index
    %c0_84 = arith.constant 0 : index
    %c0_85 = arith.constant 0 : index
    %419 = vector.load %arg8[%c1_83, %c0_84, %c0_85] : memref<9x32x32xbf16, #tpu.memory_space<vmem>>, vector<1x32x32xbf16>
    %420 = vector.shape_cast %419 : vector<1x32x32xbf16> to vector<32x32xbf16>
    %cst_86 = arith.constant dense<0.000000e+00> : vector<8x32xf32>
    %421 = tpu.matmul %418, %420, %cst_86 {dimension_numbers = #tpu.dot_dimension_numbers<[1], [0], [0], [1], [0, 0, 1, 1], [], []>} : vector<8x32xbf16>, vector<32x32xbf16>, vector<8x32xf32> -> vector<8x32xf32>
    %c1_87 = arith.constant 1 : index
    %c0_88 = arith.constant 0 : index
    %c0_89 = arith.constant 0 : index
    %422 = vector.load %arg9[%c1_87, %c0_88, %c0_89] : memref<9x1x32xf32, #tpu.memory_space<vmem>>, vector<1x1x32xf32>
    %423 = vector.shape_cast %422 : vector<1x1x32xf32> to vector<1x32xf32>
    %424 = vector.broadcast %423 : vector<1x32xf32> to vector<8x32xf32>
    %425 = arith.addf %421, %424 : vector<8x32xf32>
    %cst_90 = arith.constant 0.000000e+00 : f32
    %426 = vector.broadcast %cst_90 : f32 to vector<8x32xf32>
    %427 = arith.maximumf %425, %426 : vector<8x32xf32>
    %428 = arith.truncf %427 : vector<8x32xf32> to vector<8x32xbf16>
    %c2_91 = arith.constant 2 : index
    %c0_92 = arith.constant 0 : index
    %c0_93 = arith.constant 0 : index
    %429 = vector.load %arg8[%c2_91, %c0_92, %c0_93] : memref<9x32x32xbf16, #tpu.memory_space<vmem>>, vector<1x32x32xbf16>
    %430 = vector.shape_cast %429 : vector<1x32x32xbf16> to vector<32x32xbf16>
    %cst_94 = arith.constant dense<0.000000e+00> : vector<8x32xf32>
    %431 = tpu.matmul %428, %430, %cst_94 {dimension_numbers = #tpu.dot_dimension_numbers<[1], [0], [0], [1], [0, 0, 1, 1], [], []>} : vector<8x32xbf16>, vector<32x32xbf16>, vector<8x32xf32> -> vector<8x32xf32>
    %c2_95 = arith.constant 2 : index
    %c0_96 = arith.constant 0 : index
    %c0_97 = arith.constant 0 : index
    %432 = vector.load %arg9[%c2_95, %c0_96, %c0_97] : memref<9x1x32xf32, #tpu.memory_space<vmem>>, vector<1x1x32xf32>
    %433 = vector.shape_cast %432 : vector<1x1x32xf32> to vector<1x32xf32>
    %434 = vector.broadcast %433 : vector<1x32xf32> to vector<8x32xf32>
    %435 = arith.addf %431, %434 : vector<8x32xf32>
    %cst_98 = arith.constant 0.000000e+00 : f32
    %436 = vector.broadcast %cst_98 : f32 to vector<8x32xf32>
    %437 = arith.maximumf %435, %436 : vector<8x32xf32>
    %438 = arith.truncf %437 : vector<8x32xf32> to vector<8x32xbf16>
    %c3_99 = arith.constant 3 : index
    %c0_100 = arith.constant 0 : index
    %c0_101 = arith.constant 0 : index
    %439 = vector.load %arg8[%c3_99, %c0_100, %c0_101] : memref<9x32x32xbf16, #tpu.memory_space<vmem>>, vector<1x32x32xbf16>
    %440 = vector.shape_cast %439 : vector<1x32x32xbf16> to vector<32x32xbf16>
    %cst_102 = arith.constant dense<0.000000e+00> : vector<8x32xf32>
    %441 = tpu.matmul %438, %440, %cst_102 {dimension_numbers = #tpu.dot_dimension_numbers<[1], [0], [0], [1], [0, 0, 1, 1], [], []>} : vector<8x32xbf16>, vector<32x32xbf16>, vector<8x32xf32> -> vector<8x32xf32>
    %c3_103 = arith.constant 3 : index
    %c0_104 = arith.constant 0 : index
    %c0_105 = arith.constant 0 : index
    %442 = vector.load %arg9[%c3_103, %c0_104, %c0_105] : memref<9x1x32xf32, #tpu.memory_space<vmem>>, vector<1x1x32xf32>
    %443 = vector.shape_cast %442 : vector<1x1x32xf32> to vector<1x32xf32>
    %444 = vector.broadcast %443 : vector<1x32xf32> to vector<8x32xf32>
    %445 = arith.addf %441, %444 : vector<8x32xf32>
    %cst_106 = arith.constant 0.000000e+00 : f32
    %446 = vector.broadcast %cst_106 : f32 to vector<8x32xf32>
    %447 = arith.maximumf %445, %446 : vector<8x32xf32>
    %448 = arith.truncf %447 : vector<8x32xf32> to vector<8x32xbf16>
    %c4_107 = arith.constant 4 : index
    %c0_108 = arith.constant 0 : index
    %c0_109 = arith.constant 0 : index
    %449 = vector.load %arg8[%c4_107, %c0_108, %c0_109] : memref<9x32x32xbf16, #tpu.memory_space<vmem>>, vector<1x32x32xbf16>
    %450 = vector.shape_cast %449 : vector<1x32x32xbf16> to vector<32x32xbf16>
    %cst_110 = arith.constant dense<0.000000e+00> : vector<8x32xf32>
    %451 = tpu.matmul %448, %450, %cst_110 {dimension_numbers = #tpu.dot_dimension_numbers<[1], [0], [0], [1], [0, 0, 1, 1], [], []>} : vector<8x32xbf16>, vector<32x32xbf16>, vector<8x32xf32> -> vector<8x32xf32>
    %c4_111 = arith.constant 4 : index
    %c0_112 = arith.constant 0 : index
    %c0_113 = arith.constant 0 : index
    %452 = vector.load %arg9[%c4_111, %c0_112, %c0_113] : memref<9x1x32xf32, #tpu.memory_space<vmem>>, vector<1x1x32xf32>
    %453 = vector.shape_cast %452 : vector<1x1x32xf32> to vector<1x32xf32>
    %454 = vector.broadcast %453 : vector<1x32xf32> to vector<8x32xf32>
    %455 = arith.addf %451, %454 : vector<8x32xf32>
    %cst_114 = arith.constant 0.000000e+00 : f32
    %456 = vector.broadcast %cst_114 : f32 to vector<8x32xf32>
    %457 = arith.maximumf %455, %456 : vector<8x32xf32>
    %458 = arith.truncf %457 : vector<8x32xf32> to vector<8x32xbf16>
    %c5_115 = arith.constant 5 : index
    %c0_116 = arith.constant 0 : index
    %c0_117 = arith.constant 0 : index
    %459 = vector.load %arg8[%c5_115, %c0_116, %c0_117] : memref<9x32x32xbf16, #tpu.memory_space<vmem>>, vector<1x32x32xbf16>
    %460 = vector.shape_cast %459 : vector<1x32x32xbf16> to vector<32x32xbf16>
    %cst_118 = arith.constant dense<0.000000e+00> : vector<8x32xf32>
    %461 = tpu.matmul %458, %460, %cst_118 {dimension_numbers = #tpu.dot_dimension_numbers<[1], [0], [0], [1], [0, 0, 1, 1], [], []>} : vector<8x32xbf16>, vector<32x32xbf16>, vector<8x32xf32> -> vector<8x32xf32>
    %c5_119 = arith.constant 5 : index
    %c0_120 = arith.constant 0 : index
    %c0_121 = arith.constant 0 : index
    %462 = vector.load %arg9[%c5_119, %c0_120, %c0_121] : memref<9x1x32xf32, #tpu.memory_space<vmem>>, vector<1x1x32xf32>
    %463 = vector.shape_cast %462 : vector<1x1x32xf32> to vector<1x32xf32>
    %464 = vector.broadcast %463 : vector<1x32xf32> to vector<8x32xf32>
    %465 = arith.addf %461, %464 : vector<8x32xf32>
    %cst_122 = arith.constant 0.000000e+00 : f32
    %466 = vector.broadcast %cst_122 : f32 to vector<8x32xf32>
    %467 = arith.maximumf %465, %466 : vector<8x32xf32>
    %468 = arith.truncf %467 : vector<8x32xf32> to vector<8x32xbf16>
    %c6_123 = arith.constant 6 : index
    %c0_124 = arith.constant 0 : index
    %c0_125 = arith.constant 0 : index
    %469 = vector.load %arg8[%c6_123, %c0_124, %c0_125] : memref<9x32x32xbf16, #tpu.memory_space<vmem>>, vector<1x32x32xbf16>
    %470 = vector.shape_cast %469 : vector<1x32x32xbf16> to vector<32x32xbf16>
    %cst_126 = arith.constant dense<0.000000e+00> : vector<8x32xf32>
    %471 = tpu.matmul %468, %470, %cst_126 {dimension_numbers = #tpu.dot_dimension_numbers<[1], [0], [0], [1], [0, 0, 1, 1], [], []>} : vector<8x32xbf16>, vector<32x32xbf16>, vector<8x32xf32> -> vector<8x32xf32>
    %c6_127 = arith.constant 6 : index
    %c0_128 = arith.constant 0 : index
    %c0_129 = arith.constant 0 : index
    %472 = vector.load %arg9[%c6_127, %c0_128, %c0_129] : memref<9x1x32xf32, #tpu.memory_space<vmem>>, vector<1x1x32xf32>
    %473 = vector.shape_cast %472 : vector<1x1x32xf32> to vector<1x32xf32>
    %474 = vector.broadcast %473 : vector<1x32xf32> to vector<8x32xf32>
    %475 = arith.addf %471, %474 : vector<8x32xf32>
    %cst_130 = arith.constant 0.000000e+00 : f32
    %476 = vector.broadcast %cst_130 : f32 to vector<8x32xf32>
    %477 = arith.maximumf %475, %476 : vector<8x32xf32>
    %478 = arith.truncf %477 : vector<8x32xf32> to vector<8x32xbf16>
    %c7_131 = arith.constant 7 : index
    %c0_132 = arith.constant 0 : index
    %c0_133 = arith.constant 0 : index
    %479 = vector.load %arg8[%c7_131, %c0_132, %c0_133] : memref<9x32x32xbf16, #tpu.memory_space<vmem>>, vector<1x32x32xbf16>
    %480 = vector.shape_cast %479 : vector<1x32x32xbf16> to vector<32x32xbf16>
    %cst_134 = arith.constant dense<0.000000e+00> : vector<8x32xf32>
    %481 = tpu.matmul %478, %480, %cst_134 {dimension_numbers = #tpu.dot_dimension_numbers<[1], [0], [0], [1], [0, 0, 1, 1], [], []>} : vector<8x32xbf16>, vector<32x32xbf16>, vector<8x32xf32> -> vector<8x32xf32>
    %c7_135 = arith.constant 7 : index
    %c0_136 = arith.constant 0 : index
    %c0_137 = arith.constant 0 : index
    %482 = vector.load %arg9[%c7_135, %c0_136, %c0_137] : memref<9x1x32xf32, #tpu.memory_space<vmem>>, vector<1x1x32xf32>
    %483 = vector.shape_cast %482 : vector<1x1x32xf32> to vector<1x32xf32>
    %484 = vector.broadcast %483 : vector<1x32xf32> to vector<8x32xf32>
    %485 = arith.addf %481, %484 : vector<8x32xf32>
    %cst_138 = arith.constant 0.000000e+00 : f32
    %486 = vector.broadcast %cst_138 : f32 to vector<8x32xf32>
    %487 = arith.maximumf %485, %486 : vector<8x32xf32>
    %488 = arith.truncf %487 : vector<8x32xf32> to vector<8x32xbf16>
    %c8 = arith.constant 8 : index
    %c0_139 = arith.constant 0 : index
    %c0_140 = arith.constant 0 : index
    %489 = vector.load %arg8[%c8, %c0_139, %c0_140] : memref<9x32x32xbf16, #tpu.memory_space<vmem>>, vector<1x32x32xbf16>
    %490 = vector.shape_cast %489 : vector<1x32x32xbf16> to vector<32x32xbf16>
    %cst_141 = arith.constant dense<0.000000e+00> : vector<8x32xf32>
    %491 = tpu.matmul %488, %490, %cst_141 {dimension_numbers = #tpu.dot_dimension_numbers<[1], [0], [0], [1], [0, 0, 1, 1], [], []>} : vector<8x32xbf16>, vector<32x32xbf16>, vector<8x32xf32> -> vector<8x32xf32>
    %c8_142 = arith.constant 8 : index
    %c0_143 = arith.constant 0 : index
    %c0_144 = arith.constant 0 : index
    %492 = vector.load %arg9[%c8_142, %c0_143, %c0_144] : memref<9x1x32xf32, #tpu.memory_space<vmem>>, vector<1x1x32xf32>
    %493 = vector.shape_cast %492 : vector<1x1x32xf32> to vector<1x32xf32>
    %494 = vector.broadcast %493 : vector<1x32xf32> to vector<8x32xf32>
    %495 = arith.addf %491, %494 : vector<8x32xf32>
    %cst_145 = arith.constant 0.000000e+00 : f32
    %496 = vector.broadcast %cst_145 : f32 to vector<8x32xf32>
    %497 = arith.maximumf %495, %496 : vector<8x32xf32>
    %498 = arith.truncf %497 : vector<8x32xf32> to vector<8x32xbf16>
    %c0_146 = arith.constant 0 : index
    %c0_147 = arith.constant 0 : index
    %499 = vector.load %arg10[%c0_146, %c0_147] : memref<32x4xbf16, #tpu.memory_space<vmem>>, vector<32x4xbf16>
    %cst_148 = arith.constant dense<0.000000e+00> : vector<8x4xf32>
    %500 = tpu.matmul %498, %499, %cst_148 {dimension_numbers = #tpu.dot_dimension_numbers<[1], [0], [0], [1], [0, 0, 1, 1], [], []>} : vector<8x32xbf16>, vector<32x4xbf16>, vector<8x4xf32> -> vector<8x4xf32>
    %c0_149 = arith.constant 0 : index
    %c0_150 = arith.constant 0 : index
    %501 = vector.load %arg11[%c0_149, %c0_150] : memref<1x4xf32, #tpu.memory_space<vmem>>, vector<1x4xf32>
    %502 = vector.broadcast %501 : vector<1x4xf32> to vector<8x4xf32>
    %503 = arith.addf %500, %502 : vector<8x4xf32>
    %c0_151 = arith.constant 0 : index
    %c0_152 = arith.constant 0 : index
    %504 = vector.load %arg12[%c0_151, %c0_152] : memref<8x4xf32, #tpu.memory_space<vmem>>, vector<8x4xf32>
    tpu.vector_store %arg12[%c0_151, %c0_152], %503 {strides = array<i32>} : memref<8x4xf32, #tpu.memory_space<vmem>>, vector<8x4xf32>,
    return
  }
}

</mosaic_0001>

<bundles_post_ra>
// kernel: tpu_custom_call.1
= control target key start
LH: loop header
LB: loop body
LE: loop exit
PB: predicated region body
PF: predicated region fallthrough
CT: control target
= control target key end

     0   :  { %17 = vsyncpa [#allocation3], 0  ;;  %s3057_s0 = inlined_call_operand.hbm [shape: f32[8,8], index: 0, kind: input, shape index: {}]   ;;  %s3058_s1 = inlined_call_operand.hbm [shape: f32[1,128], index: 1, kind: input, shape index: {}]   ;;  %s3059_s2 = inlined_call_operand.hbm [shape: f32[1,128], index: 2, kind: input, shape index: {}]   ;;  %s3060_s3 = inlined_call_operand.vmem [shape: bf16[32,128], index: 3, kind: input, shape index: {}]   ;;  %s3061_s4 = inlined_call_operand.hbm [shape: bf16[64,128], index: 4, kind: input, shape index: {}]   ;;  %s3062_s5 = inlined_call_operand.hbm [shape: f32[1,128], index: 5, kind: input, shape index: {}]   ;;  %s3063_s6 = inlined_call_operand.hbm [shape: bf16[8,32,32], index: 6, kind: input, shape index: {}]   ;;  %s3064_s7 = inlined_call_operand.hbm [shape: f32[1,32], index: 7, kind: input, shape index: {}]   ;;  %s3065_s8 = inlined_call_operand.hbm [shape: bf16[9,32,32], index: 8, kind: input, shape index: {}]   ;;  %s3066_s9 = inlined_call_operand.vmem [shape: f32[9,1,32], index: 9, kind: input, shape index: {}]   ;;  %s3067_s10 = inlined_call_operand.vmem [shape: bf16[32,4], index: 10, kind: input, shape index: {}]   ;;  %s3068_s11 = inlined_call_operand.vmem [shape: f32[1,4], index: 11, kind: input, shape index: {}]   ;;  %s3069_s12 = inlined_call_operand.vmem [shape: f32[8,4], index: 12, kind: output, shape index: {}]  }
   0x1   :  { %18 = vsyncpa [#allocation5], 0 }
   0x2   :  { %19 = vsyncpa [#allocation8], 0 }
   0x3   :  { %20 = vsyncpa [#allocation11], 0  ;;  %s38_s23 = sshll.u32 %s3058_s1, 4  ;;  %s39_s23 = int_to_ptr.hbm [resolvable:$true] %s38_s23 }
   0x4   :  { %21 = vsyncpa [#allocation14], 0  ;;  %s2590_s24 = smov [#allocation4]   ;;  %s61_s28 = sshll.u32 %s3061_s4, 4  ;;  %s62_s28 = int_to_ptr.hbm [resolvable:$true] %s61_s28 }
   0x5   :  { %s40_s25 = sshll.u32 %s2590_s24, 4  ;;  %s2591_s29 = smov [#allocation7]   ;;  %s41_s25 = int_to_ptr.vmem [resolvable:$true] %s40_s25 }
   0x6   :  { %43 = dma.hbm_to_vmem [thread:$0]  %s39_s23, 16, %s41_s25, [#allocation5]  }
   0x7   :  { %s63_s30 = sshll.u32 %s2591_s29, 4  ;;  %s2592_s13 = smov 64   ;;  %s64_s30 = int_to_ptr.vmem [resolvable:$true] %s63_s30 }
   0x8   :  { %s2593_s14 = smov 4   ;;  %s85_s16 = sshll.u32 %s3063_s6, 4  ;;  %s86_s16 = int_to_ptr.hbm [resolvable:$true] %s85_s16 }
   0x9   :  { %69 = dma.hbm_to_vmem [thread:$0]  %s62_s28, 512, %s64_s30, [#allocation8], %s2592_s13, %s2592_s13, %s2593_s14  }
   0xa   :  { %s2594_s17 = smov [#allocation10]   ;;  %s27_s20 = sshll.u32 %s3057_s0, 4  ;;  %s28_s20 = int_to_ptr.hbm [resolvable:$true] %s27_s20 }
   0xb   :  { %s87_s18 = sshll.u32 %s2594_s17, 4  ;;  %s2595_s21 = smov [#allocation2]   ;;  %s88_s18 = int_to_ptr.vmem [resolvable:$true] %s87_s18 }
   0xc   :  { %93 = dma.hbm_to_vmem [thread:$0]  %s86_s16, 2048, %s88_s18, [#allocation11], %s2592_s13, %s2592_s13, %s2593_s14  }
   0xd   :  { %s29_s22 = sshll.u32 %s2595_s21, 4  ;;  %s49_s25 = sshll.u32 %s3059_s2, 4  ;;  %s30_s22 = int_to_ptr.vmem [resolvable:$true] %s29_s22  ;;  %s50_s25 = int_to_ptr.hbm [resolvable:$true] %s49_s25 }
   0xe   :  { %32 = dma.hbm_to_vmem [thread:$0]  %s28_s20, 128, %s30_s22, [#allocation3]  }
   0xf   :  { %s75_s27 = sshll.u32 %s3062_s5, 4  ;;  %s2596_s28 = smov [#allocation6]   ;;  %s76_s27 = int_to_ptr.hbm [resolvable:$true] %s75_s27 }
  0x10   :  { %s51_s0 = sshll.u32 %s2596_s28, 4  ;;  %s2597_s29 = smov [#allocation9]   ;;  %s52_s0 = int_to_ptr.vmem [resolvable:$true] %s51_s0 }
  0x11   :  { %54 = dma.hbm_to_vmem [thread:$0]  %s50_s25, 16, %s52_s0, [#allocation5]  }
  0x12   :  { %s77_s30 = sshll.u32 %s2597_s29, 4  ;;  %s99_s16 = sshll.u32 %s3064_s7, 4  ;;  %s78_s30 = int_to_ptr.vmem [resolvable:$true] %s77_s30  ;;  %s100_s16 = int_to_ptr.hbm [resolvable:$true] %s99_s16 }
  0x13   :  { %80 = dma.hbm_to_vmem [thread:$0]  %s76_s27, 16, %s78_s30, [#allocation8]  }
  0x14   :  { %s109_s18 = sshll.u32 %s3065_s8, 4  ;;  %s2598_s4 = smov [#allocation12]   ;;  %s110_s18 = int_to_ptr.hbm [resolvable:$true] %s109_s18 }
  0x15   :  { %s101_s5 = sshll.u32 %s2598_s4, 4  ;;  %s2599_s19 = smov [#allocation13]   ;;  %s102_s5 = int_to_ptr.vmem [resolvable:$true] %s101_s5 }
  0x16   :  { %104 = dma.hbm_to_vmem [thread:$0]  %s100_s16, 16, %s102_s5, [#allocation11]  }
  0x17   :  { %s111_s20 = sshll.u32 %s2599_s19, 4  ;;  %s112_s20 = int_to_ptr.vmem [resolvable:$true] %s111_s20 }
  0x18   :  { %117 = dma.hbm_to_vmem [thread:$0]  %s110_s18, 2304, %s112_s20, [#allocation14], %s2592_s13, %s2592_s13, %s2593_s14  }
  0x19   :  { %2580 = dma.done.wait [#allocation3], 128  }
  0x1a   :  { %2581 = vsyncadd [#allocation3], 4294967168 }
  0x1b   :  { %2582 = dma.done.wait [#allocation5], 32  }
  0x1c   :  { %2583 = vsyncadd [#allocation5], 4294967264 }
  0x1d   :  { %2584 = dma.done.wait [#allocation8], 528  }
  0x1e   :  { %2585 = vsyncadd [#allocation8], 4294966768 }
  0x1f   :  { %2586 = dma.done.wait [#allocation11], 2064  }
  0x20   :  { %2587 = vsyncadd [#allocation11], 4294965232 }
  0x21   :  { %2588 = dma.done.wait [#allocation14], 2304  }
  0x22   :  { %2589 = vsyncadd [#allocation14], 4294964992  ;;  %v2600_v0 = vmov 0   ;;  %v2710_v1 = vld [vmem:[%s3060_s3 + $0x8] sm:$0xff]  ;;  %v2712_v2 = vld [vmem:[#allocation2] sm:$0xff]  ;;  %s2601_s22 = smov 32  }
  0x23   :  { %2228 = vset.pattern.permute.xlu0 %v2600_v0  ;;  %v2717_v3 = vld [vmem:[%s3060_s3] sm:$0xff]  ;;  %250 = vmatpush.bf16.msra.mxu0 %v2710_v1  ;;  %v2724_v4 = vld [vmem:[#allocation4] ss:$0 sm:$0xff]  ;;  %v2727_v7 = vld [vmem:[#allocation6] ss:$0 sm:$0xff]  ;;  %v2602_v39 = vmov 1  }
  0x24   :  { %175 = vperm.xlu0 %2228, %v2712_v2   ;;  %400 = vmatpush.bf16.msra.mxu2 %v2710_v1  ;;  %v2736_v32 = vld [vmem:[#allocation7 + $0x18] sm:$0xff]  ;;  %v2742_v36 = vld [vmem:[#allocation7 + $0x10] sm:$0xff]  ;;  %v2745_v37 = vld [vmem:[#allocation7 + $0x8] sm:$0xff]  ;;  %vm240_vm4 = vcmask 261120   ;;  %vm328_vm5 = vcmask 523264  }
  0x25   :  { %336 = vmatpush.bf16.msra.mxu1 %v2736_v32  ;;  %462 = vmatpush.bf16.msra.mxu3 %v2736_v32  ;;  %v2750_v38 = vld [vmem:[#allocation7] sm:$0xff] }
  0x26   :  { %v2770_v49 = vld [vmem:[#allocation9] ss:$0 sm:$0xff] }
  0x27   :  { %251 = vmatpush.bf16.msra.mxu0 %v2717_v3 }
  0x28   :  { %401 = vmatpush.bf16.msra.mxu2 %v2717_v3 }
  0x29   :  { %337 = vmatpush.bf16.msra.mxu1 %v2742_v36  ;;  %463 = vmatpush.bf16.msra.mxu3 %v2742_v36 }
  0x2a   :  { %252 = vmatmul.bf16.vlgmr.msra.gmra.mxu0 %v2600_v0 }
  0x2c   :  { %2229 = vset.pattern.permute.xlu0 %v2602_v39 }
  0x2d   :  { %338 = vmatpush.bf16.msra.mxu1 %v2745_v37  ;;  %464 = vmatpush.bf16.msra.mxu3 %v2745_v37 }
  0x31   :  { %339 = vmatpush.bf16.msra.mxu1 %v2750_v38  ;;  %465 = vmatpush.bf16.msra.mxu3 %v2750_v38 }
  0x35   :  { %589 = vmatpush.bf16.msrb.mxu1 %v2710_v1  ;;  %651 = vmatpush.bf16.msrb.mxu3 %v2736_v32 }
  0x39   :  { %590 = vmatpush.bf16.msrb.mxu1 %v2717_v3  ;;  %652 = vmatpush.bf16.msrb.mxu3 %v2742_v36 }
  0x3d   :  { %653 = vmatpush.bf16.msrb.mxu3 %v2745_v37 }
  0x41   :  { %654 = vmatpush.bf16.msrb.mxu3 %v2750_v38 }
  0x96   :  { %v176_v5 = vpop.permute.xlu0 %175 }
  0x97   :  { %v181_v6 = vmul.f32 %v2724_v4, %v176_v5 }
  0x99   :  { %v185_v8 = vadd.f32 %v2727_v7, %v181_v6 }
  0xa7   :  { %v253_v9 = vpop.f32.mrf.mxu0 }
  0xa8   :  { %v257_v10 = vadd.f32 %v253_v9, %v185_v8 }
  0xaa   :  { %2250 = vtanh.f32 %v257_v10  ;;  %v1950_v13 = vmul.f32 -1.442695, %v257_v10 }
  0xac   :  { %2252 = vpow2.f32 %v1950_v13 }
  0xaf   :  { %v255_v11 = vpop.f32.mrf.mxu0 }
  0xb0   :  { %v2251_v12 = vpop.eup %2250 }
  0xb1   :  { %280 = vrot.lane.b32.xlu0 %v2251_v12, %s2592_s13 }
  0xb2   :  { %v2253_v14 = vpop.eup %2252 }
  0xb3   :  { %v261_v15 = vadd.f32 1.0, %v2253_v14 }
  0xb5   :  { %2254 = vrcp.f32 %v261_v15  ;;  %v273_v21 = vand.u32 2147483648, %v261_v15  ;;  %vm267_vm1 = vweird.f32 %v261_v15  ;;  %v271_v22 = vand.u32 2147483647, %v261_v15 }
  0xb7   :  { %v274_v24 = vor.u32 1.1754944e-38, %v273_v21  ;;  %vm272_vm3 = vcmp.eq.f32.partialorder %v271_v22, 8.507059e+37 }
  0xb9   :  { %187 = vperm.xlu0 %2229, %v2712_v2  }
  0xbb   :  { %v2255_v16 = vpop.eup %2254 }
  0xbc   :  { %v263_v17 = vmul.f32 %v2255_v16, %v261_v15  ;;  %vm268_vm0 = vweird.f32 %v2255_v16 }
  0xbd   :  { %vm269_vm2 = vmor %vm267_vm1, %vm268_vm0 }
  0xbe   :  { %v264_v18 = vsub.f32 1.0, %v263_v17 }
  0xc0   :  { %v265_v19 = vmul.f32 %v2255_v16, %v264_v18 }
  0xc2   :  { %v266_v20 = vadd.f32 %v2255_v16, %v265_v19 }
  0xc4   :  { %v270_v23 = vsel %vm269_vm2, %v2255_v16, %v266_v20 }
  0xc5   :  { %v275_v26 = vsel %vm272_vm3, %v274_v24, %v270_v23 }
  0xc6   :  { %v278_v28 = vmul.f32 0.0, %v275_v26 }
 0x123   :  { %v281_v25 = vpop.permute.xlu0 %280 }
 0x124   :  { %v283_v27 = vmul.f32 %v281_v25, %v275_v26 }
 0x126   :  { %285 = vrot.lane.b32.xlu1 %v283_v27, %s2601_s22 }
 0x12b   :  { %v188_v44 = vpop.permute.xlu0 %187 }
 0x12c   :  { %v190_v45 = vmul.f32 %v2724_v4, %v188_v44  ;;  %v2603_v44 = vmov 2  }
 0x12d   :  { %2230 = vset.pattern.permute.xlu2 %v2603_v44 }
 0x12e   :  { %v191_v46 = vadd.f32 %v2727_v7, %v190_v45 }
 0x198   :  { %v286_v29 = vpop.permute.xlu1 %285 }
 0x199   :  { %v2732_v30 = vadd.f32 %v286_v29, %v278_v28 }
 0x19b   :  { %2256 = vtanh.f32 %v2732_v30 }
 0x1a1   :  { %v2257_v31 = vpop.eup %2256 }
 0x1a2   :  { %291 = vrot.lane.b32.xlu1 %v2257_v31, %s2592_s13 }
 0x214   :  { %v292_v33 = vpop.permute.xlu1 %291 }
 0x215   :  { %v294_v34 = vmul.f32 %v292_v33, %v275_v26 }
 0x217   :  { %v387_v35 = vpack.c.bf16 %v294_v34, %v294_v34 }
 0x219   :  { %389 = vrot.lane.b32.xlu2 %v387_v35, %s2601_s22 }
 0x221   :  { %296 = vrot.lane.b32.xlu2 %v294_v34, %s2601_s22 }
 0x273   :  { %v390_v40 = vpop.permute.xlu2 %389 }
 0x274   :  { %1969 = vmatmul.msk.bf16.vlgmr.msra.gmra.mxu2 %vm240_vm4, %v390_v40 }
 0x27b   :  { %v297_v41 = vpop.permute.xlu2 %296 }
 0x27c   :  { %v299_v42 = vsel %vm240_vm4, %v297_v41, 0.0 }
 0x27d   :  { %v300_v43 = vpack.c.bf16 %v299_v42, %v299_v42 }
 0x27f   :  { %1967 = vmatmul.msk.bf16.vlgmr.msra.gmra.mxu1 %vm328_vm5, %v300_v43 }
 0x280   :  { %810 = vmatpush.bf16.msra.mxu1 %v2736_v32 }
 0x284   :  { %811 = vmatpush.bf16.msra.mxu1 %v2742_v36 }
 0x288   :  { %812 = vmatpush.bf16.msra.mxu1 %v2745_v37 }
 0x28c   :  { %813 = vmatpush.bf16.msra.mxu1 %v2750_v38 }
 0x2f7   :  { %v403_v47 = vpop.f32.mrf.mxu2 }
 0x2f8   :  { %v407_v48 = vadd.f32 %v403_v47, %v191_v46 }
 0x2fa   :  { %2258 = vtanh.f32 %v407_v48  ;;  %v1970_v56 = vmul.f32 -1.442695, %v407_v48 }
 0x2fc   :  { %v341_v50 = vpop.f32.mrf.mxu1 }
 0x2fd   :  { %v342_v51 = vadd.f32 %v2770_v49, %v341_v50 }
 0x2ff   :  { %2260 = vtanh.f32 %v342_v51  ;;  %v405_v52 = vpop.f32.mrf.mxu2  ;;  %v1968_v61 = vmul.f32 -1.442695, %v342_v51 }
 0x300   :  { %v2259_v53 = vpop.eup %2258  ;;  %2262 = vpow2.f32 %v1970_v56 }
 0x301   :  { %430 = vrot.lane.b32.xlu2 %v2259_v53, %s2592_s13 }
 0x304   :  { %v343_v54 = vpop.f32.mrf.mxu1 }
 0x305   :  { %v2261_v55 = vpop.eup %2260 }
 0x306   :  { %367 = vrot.lane.b32.xlu1 %v2261_v55, %s2592_s13  ;;  %v2263_v57 = vpop.eup %2262 }
 0x307   :  { %v411_v58 = vadd.f32 1.0, %v2263_v57 }
 0x309   :  { %2264 = vrcp.f32 %v411_v58  ;;  %v423_v6 = vand.u32 2147483648, %v411_v58  ;;  %vm417_vm7 = vweird.f32 %v411_v58  ;;  %v421_v8 = vand.u32 2147483647, %v411_v58 }
 0x30a   :  { %2266 = vpow2.f32 %v1968_v61 }
 0x30b   :  { %v424_v11 = vor.u32 1.1754944e-38, %v423_v6  ;;  %vm422_vm9 = vcmp.eq.f32.partialorder %v421_v8, 8.507059e+37 }
 0x30f   :  { %v2265_v59 = vpop.eup %2264 }
 0x310   :  { %v413_v60 = vmul.f32 %v2265_v59, %v411_v58  ;;  %vm418_vm6 = vweird.f32 %v2265_v59  ;;  %v2267_v5 = vpop.eup %2266 }
 0x311   :  { %vm419_vm8 = vmor %vm417_vm7, %vm418_vm6  ;;  %v348_v9 = vadd.f32 1.0, %v2267_v5 }
 0x312   :  { %v414_v62 = vsub.f32 1.0, %v413_v60 }
 0x313   :  { %2268 = vrcp.f32 %v348_v9  ;;  %v360_v20 = vand.u32 2147483648, %v348_v9  ;;  %vm354_vm11 = vweird.f32 %v348_v9  ;;  %v358_v21 = vand.u32 2147483647, %v348_v9 }
 0x314   :  { %v415_v63 = vmul.f32 %v2265_v59, %v414_v62 }
 0x315   :  { %v361_v23 = vor.u32 1.1754944e-38, %v360_v20  ;;  %vm359_vm13 = vcmp.eq.f32.partialorder %v358_v21, 8.507059e+37 }
 0x316   :  { %v416_v0 = vadd.f32 %v2265_v59, %v415_v63 }
 0x318   :  { %v420_v10 = vsel %vm419_vm8, %v2265_v59, %v416_v0 }
 0x319   :  { %v425_v12 = vsel %vm422_vm9, %v424_v11, %v420_v10  ;;  %v2269_v15 = vpop.eup %2268 }
 0x31a   :  { %v350_v16 = vmul.f32 %v2269_v15, %v348_v9  ;;  %vm355_vm10 = vweird.f32 %v2269_v15  ;;  %v428_v27 = vmul.f32 %v425_v12, %v2732_v30 }
 0x31b   :  { %vm356_vm12 = vmor %vm354_vm11, %vm355_vm10 }
 0x31c   :  { %v351_v17 = vsub.f32 1.0, %v350_v16 }
 0x31e   :  { %v352_v18 = vmul.f32 %v2269_v15, %v351_v17 }
 0x320   :  { %v353_v19 = vadd.f32 %v2269_v15, %v352_v18 }
 0x322   :  { %v357_v22 = vsel %vm356_vm12, %v2269_v15, %v353_v19 }
 0x323   :  { %v362_v25 = vsel %vm359_vm13, %v361_v23, %v357_v22 }
 0x324   :  { %v365_v33 = vmul.f32 0.0, %v362_v25 }
 0x35b   :  { %v431_v13 = vpop.permute.xlu2 %430 }
 0x35c   :  { %v433_v14 = vmul.f32 %v431_v13, %v425_v12 }
 0x35e   :  { %435 = vrot.lane.b32.xlu2 %v433_v14, %s2601_s22 }
 0x378   :  { %v368_v24 = vpop.permute.xlu1 %367 }
 0x379   :  { %v370_v26 = vmul.f32 %v368_v24, %v362_v25 }
 0x37b   :  { %372 = vrot.lane.b32.xlu1 %v370_v26, %s2601_s22 }
 0x3b8   :  { %v436_v28 = vpop.permute.xlu2 %435 }
 0x3b9   :  { %v2778_v29 = vadd.f32 %v436_v28, %v428_v27 }
 0x3bb   :  { %2270 = vtanh.f32 %v2778_v29 }
 0x3c1   :  { %v2271_v31 = vpop.eup %2270 }
 0x3c2   :  { %441 = vrot.lane.b32.xlu1 %v2271_v31, %s2592_s13 }
 0x3ed   :  { %v373_v34 = vpop.permute.xlu1 %372 }
 0x3ee   :  { %v2782_v35 = vadd.f32 %v373_v34, %v365_v33 }
 0x3f0   :  { %2272 = vtanh.f32 %v2782_v35 }
 0x3f6   :  { %v2273_v39 = vpop.eup %2272 }
 0x3f7   :  { %378 = vrot.lane.b32.xlu0 %v2273_v39, %s2592_s13 }
 0x434   :  { %v442_v40 = vpop.permute.xlu1 %441 }
 0x435   :  { %v444_v41 = vmul.f32 %v442_v40, %v425_v12 }
 0x437   :  { %v576_v30 = vpack.c.bf16 %v444_v41, %v444_v41  ;;  %446 = vrot.lane.b32.xlu2 %v444_v41, %s2601_s22  ;;  %v2174_v41 = vld [vmem:[#allocation10 + $0x8] sm:$0xff] }
 0x438   :  { %569 = vmatpush.bf16.msrb.mxu2 %v2174_v41 }
 0x439   :  { %578 = vrot.lane.b32.xlu1 %v576_v30, %s2601_s22  ;;  %v2173_v30 = vld [vmem:[#allocation10] sm:$0xff] }
 0x43c   :  { %570 = vmatpush.bf16.msrb.mxu2 %v2173_v30 }
 0x43f   :  { %193 = vperm.xlu2 %2230, %v2712_v2  }
 0x440   :  { %748 = vmatpush.bf16.msra.mxu2 %v2710_v1 }
 0x444   :  { %749 = vmatpush.bf16.msra.mxu2 %v2717_v3 }
 0x469   :  { %v379_v42 = vpop.permute.xlu0 %378 }
 0x46a   :  { %v381_v43 = vmul.f32 %v379_v42, %v362_v25 }
 0x46c   :  { %450 = vrot.lane.b32.xlu0 %v381_v43, %s2592_s13  ;;  %v382_v18 = vpack.c.bf16 %v381_v43, %v381_v43 }
 0x491   :  { %v447_v46 = vpop.permute.xlu2 %446 }
 0x499   :  { %v194_v51 = vpop.permute.xlu2 %193 }
 0x49a   :  { %v196_v52 = vmul.f32 %v2724_v4, %v194_v51 }
 0x49c   :  { %v197_v53 = vadd.f32 %v2727_v7, %v196_v52 }
 0x4ab   :  { %v579_v45 = vpop.permute.xlu1 %578 }
 0x4ac   :  { %1991 = vmatmul.msk.bf16.vlgmr.msrb.gmra.mxu1 %vm240_vm4, %v579_v45 }
 0x4de   :  { %v451_v47 = vpop.permute.xlu0 %450 }
 0x4df   :  { %v453_v48 = vsel %vm240_vm4, %v447_v46, %v451_v47 }
 0x4e0   :  { %v454_v50 = vpack.c.bf16 %v453_v48, %v453_v48 }
 0x4e2   :  { %1971 = vmatmul.msk.bf16.vlgmr.msra.gmra.mxu3 %vm328_vm5, %v454_v50 }
 0x529   :  { %v592_v54 = vpop.f32.mrf.mxu1 }
 0x52a   :  { %v596_v55 = vadd.f32 %v592_v54, %v197_v53 }
 0x52c   :  { %2274 = vtanh.f32 %v596_v55  ;;  %v1992_v62 = vmul.f32 -1.442695, %v596_v55 }
 0x531   :  { %v594_v56 = vpop.f32.mrf.mxu1 }
 0x532   :  { %v2275_v57 = vpop.eup %2274 }
 0x533   :  { %619 = vrot.lane.b32.xlu1 %v2275_v57, %s2592_s13  ;;  %v2604_v57 = vmov 3  }
 0x534   :  { %2231 = vset.pattern.permute.xlu1 %v2604_v57 }
 0x565   :  { %v467_v58 = vpop.f32.mrf.mxu3 }
 0x566   :  { %v468_v59 = vadd.f32 %v2770_v49, %v467_v58 }
 0x568   :  { %2276 = vtanh.f32 %v468_v59  ;;  %v1972_v19 = vmul.f32 -1.442695, %v468_v59 }
 0x569   :  { %2278 = vpow2.f32 %v1992_v62 }
 0x56d   :  { %v469_v60 = vpop.f32.mrf.mxu3 }
 0x56e   :  { %v2277_v61 = vpop.eup %2276 }
 0x56f   :  { %493 = vrot.lane.b32.xlu0 %v2277_v61, %s2592_s13  ;;  %v2279_v63 = vpop.eup %2278 }
 0x570   :  { %v600_v0 = vadd.f32 1.0, %v2279_v63 }
 0x572   :  { %2280 = vrcp.f32 %v600_v0  ;;  %v612_v11 = vand.u32 2147483648, %v600_v0  ;;  %vm606_vm15 = vweird.f32 %v600_v0  ;;  %v610_v12 = vand.u32 2147483647, %v600_v0 }
 0x573   :  { %2282 = vpow2.f32 %v1972_v19 }
 0x574   :  { %v613_v14 = vor.u32 1.1754944e-38, %v612_v11  ;;  %vm611_vm1 = vcmp.eq.f32.partialorder %v610_v12, 8.507059e+37 }
 0x578   :  { %v2281_v5 = vpop.eup %2280 }
 0x579   :  { %v602_v6 = vmul.f32 %v2281_v5, %v600_v0  ;;  %vm607_vm14 = vweird.f32 %v2281_v5  ;;  %v2283_v20 = vpop.eup %2282 }
 0x57a   :  { %vm608_vm0 = vmor %vm606_vm15, %vm607_vm14  ;;  %v474_v21 = vadd.f32 1.0, %v2283_v20 }
 0x57b   :  { %v603_v8 = vsub.f32 1.0, %v602_v6 }
 0x57c   :  { %2284 = vrcp.f32 %v474_v21  ;;  %v486_v27 = vand.u32 2147483648, %v474_v21  ;;  %vm480_vm3 = vweird.f32 %v474_v21  ;;  %v484_v28 = vand.u32 2147483647, %v474_v21 }
 0x57d   :  { %v604_v9 = vmul.f32 %v2281_v5, %v603_v8 }
 0x57e   :  { %v487_v33 = vor.u32 1.1754944e-38, %v486_v27  ;;  %vm485_vm7 = vcmp.eq.f32.partialorder %v484_v28, 8.507059e+37 }
 0x57f   :  { %v605_v10 = vadd.f32 %v2281_v5, %v604_v9 }
 0x581   :  { %v609_v13 = vsel %vm608_vm0, %v2281_v5, %v605_v10 }
 0x582   :  { %v614_v16 = vsel %vm611_vm1, %v613_v14, %v609_v13  ;;  %v2285_v22 = vpop.eup %2284 }
 0x583   :  { %v476_v23 = vmul.f32 %v2285_v22, %v474_v21  ;;  %vm481_vm2 = vweird.f32 %v2285_v22  ;;  %v617_v42 = vmul.f32 %v614_v16, %v2778_v29 }
 0x584   :  { %vm482_vm6 = vmor %vm480_vm3, %vm481_vm2 }
 0x585   :  { %v477_v24 = vsub.f32 1.0, %v476_v23 }
 0x587   :  { %v478_v25 = vmul.f32 %v2285_v22, %v477_v24 }
 0x589   :  { %v479_v26 = vadd.f32 %v2285_v22, %v478_v25 }
 0x58b   :  { %v483_v31 = vsel %vm482_vm6, %v2285_v22, %v479_v26 }
 0x58c   :  { %v488_v39 = vsel %vm485_vm7, %v487_v33, %v483_v31 }
 0x58d   :  { %v491_v29 = vmul.f32 %v488_v39, %v2782_v35 }
 0x5a5   :  { %v620_v15 = vpop.permute.xlu1 %619 }
 0x5a6   :  { %v622_v17 = vmul.f32 %v620_v15, %v614_v16 }
 0x5a8   :  { %624 = vrot.lane.b32.xlu0 %v622_v17, %s2601_s22 }
 0x5b0   :  { %546 = vrot.lane.b32.xlu0 %v382_v18, %s2601_s22 }
 0x5e1   :  { %v494_v34 = vpop.permute.xlu0 %493 }
 0x5e2   :  { %v496_v40 = vmul.f32 %v494_v34, %v488_v39 }
 0x5e4   :  { %498 = vrot.lane.b32.xlu2 %v496_v40, %s2601_s22 }
 0x61a   :  { %v625_v43 = vpop.permute.xlu0 %624 }
 0x61b   :  { %v2804_v44 = vadd.f32 %v625_v43, %v617_v42 }
 0x61d   :  { %2286 = vtanh.f32 %v2804_v44 }
 0x622   :  { %v547_v45 = vpop.permute.xlu0 %546 }
 0x623   :  { %v2287_v46 = vpop.eup %2286  ;;  %1990 = vmatmul.msk.bf16.vlgmr.msrb.gmra.mxu2 %vm240_vm4, %v547_v45 }
 0x624   :  { %630 = vrot.lane.b32.xlu2 %v2287_v46, %s2592_s13  ;;  %969 = vmatpush.bf16.msrb.mxu2 %v2736_v32 }
 0x628   :  { %970 = vmatpush.bf16.msrb.mxu2 %v2742_v36 }
 0x62c   :  { %971 = vmatpush.bf16.msrb.mxu2 %v2745_v37 }
 0x630   :  { %972 = vmatpush.bf16.msrb.mxu2 %v2750_v38 }
 0x63e   :  { %v499_v47 = vpop.permute.xlu2 %498 }
 0x63f   :  { %v2814_v48 = vadd.f32 %v499_v47, %v491_v29 }
 0x641   :  { %2288 = vtanh.f32 %v2814_v48 }
 0x647   :  { %v2289_v50 = vpop.eup %2288 }
 0x648   :  { %504 = vrot.lane.b32.xlu1 %v2289_v50, %s2592_s13 }
 0x67e   :  { %v631_v51 = vpop.permute.xlu2 %630 }
 0x67f   :  { %v633_v52 = vmul.f32 %v631_v51, %v614_v16 }
 0x681   :  { %v735_v53 = vpack.c.bf16 %v633_v52, %v633_v52  ;;  %635 = vrot.lane.b32.xlu1 %v633_v52, %s2601_s22 }
 0x683   :  { %737 = vrot.lane.b32.xlu0 %v735_v53, %s2601_s22 }
 0x689   :  { %199 = vperm.xlu1 %2231, %v2712_v2  }
 0x6a6   :  { %v2820_v54 = vpop.f32.mrf.mxu2 }
 0x6ae   :  { %v574_v55 = vpop.f32.mrf.mxu2 }
 0x6af   :  { %v2176_v55 = vld [vmem:[#allocation10 + $0x18] sm:$0xff] }
 0x6b0   :  { %538 = vmatpush.bf16.msrb.mxu0 %v2176_v55 }
 0x6ba   :  { %v505_v56 = vpop.permute.xlu1 %504 }
 0x6bb   :  { %v2822_v35 = vmul.f32 %v505_v56, %v488_v39  ;;  %v2175_v56 = vld [vmem:[#allocation10 + $0x10] sm:$0xff] }
 0x6bc   :  { %539 = vmatpush.bf16.msrb.mxu0 %v2175_v56 }
 0x6bd   :  { %639 = vrot.lane.b32.xlu2 %v2822_v35, %s2592_s13  ;;  %v508_v29 = vpack.c.bf16 %v2822_v35, %v2822_v35 }
 0x6f3   :  { %v636_v59 = vpop.permute.xlu1 %635 }
 0x6f5   :  { %v738_v58 = vpop.permute.xlu0 %737 }
 0x6f6   :  { %2004 = vmatmul.msk.bf16.vlgmr.msra.gmra.mxu2 %vm240_vm4, %v738_v58 }
 0x6fb   :  { %v200_v63 = vpop.permute.xlu1 %199 }
 0x6fc   :  { %v202_v0 = vmul.f32 %v2724_v4, %v200_v63 }
 0x6fe   :  { %v203_v5 = vadd.f32 %v2727_v7, %v202_v0 }
 0x717   :  { %v640_v60 = vpop.permute.xlu2 %639 }
 0x718   :  { %v642_v61 = vsel %vm240_vm4, %v636_v59, %v640_v60 }
 0x719   :  { %v643_v62 = vpack.c.bf16 %v642_v61, %v642_v61 }
 0x71b   :  { %1993 = vmatmul.msk.bf16.vlgmr.msrb.gmra.mxu3 %vm328_vm5, %v643_v62 }
 0x779   :  { %v751_v6 = vpop.f32.mrf.mxu2 }
 0x77a   :  { %v755_v8 = vadd.f32 %v751_v6, %v203_v5 }
 0x77c   :  { %2290 = vtanh.f32 %v755_v8  ;;  %v2005_v15 = vmul.f32 -1.442695, %v755_v8 }
 0x781   :  { %v753_v9 = vpop.f32.mrf.mxu2 }
 0x782   :  { %v2291_v10 = vpop.eup %2290 }
 0x783   :  { %778 = vrot.lane.b32.xlu0 %v2291_v10, %s2592_s13 }
 0x79e   :  { %v656_v11 = vpop.f32.mrf.mxu3 }
 0x79f   :  { %v657_v12 = vadd.f32 %v2770_v49, %v656_v11 }
 0x7a1   :  { %2292 = vtanh.f32 %v657_v12  ;;  %v1994_v18 = vmul.f32 -1.442695, %v657_v12  ;;  %v2178_v12 = vld [vmem:[#allocation10 + $0x28] sm:$0xff] }
 0x7a2   :  { %2294 = vpow2.f32 %v2005_v15  ;;  %727 = vmatpush.bf16.msra.mxu0 %v2178_v12 }
 0x7a6   :  { %v658_v13 = vpop.f32.mrf.mxu3 }
 0x7a7   :  { %v2293_v14 = vpop.eup %2292  ;;  %v2177_v13 = vld [vmem:[#allocation10 + $0x20] sm:$0xff] }
 0x7a8   :  { %682 = vrot.lane.b32.xlu2 %v2293_v14, %s2592_s13  ;;  %v2295_v16 = vpop.eup %2294  ;;  %728 = vmatpush.bf16.msra.mxu0 %v2177_v13  ;;  %v2605_v14 = vmov 4  }
 0x7a9   :  { %v759_v17 = vadd.f32 1.0, %v2295_v16  ;;  %2232 = vset.pattern.permute.xlu1 %v2605_v14 }
 0x7ab   :  { %2296 = vrcp.f32 %v759_v17  ;;  %v771_v27 = vand.u32 2147483648, %v759_v17  ;;  %vm765_vm9 = vweird.f32 %v759_v17  ;;  %v769_v31 = vand.u32 2147483647, %v759_v17 }
 0x7ac   :  { %2298 = vpow2.f32 %v1994_v18 }
 0x7ad   :  { %v772_v34 = vor.u32 1.1754944e-38, %v771_v27  ;;  %vm770_vm11 = vcmp.eq.f32.partialorder %v769_v31, 8.507059e+37 }
 0x7b1   :  { %v2297_v19 = vpop.eup %2296 }
 0x7b2   :  { %v2299_v20 = vpop.eup %2298  ;;  %v761_v22 = vmul.f32 %v2297_v19, %v759_v17  ;;  %vm766_vm8 = vweird.f32 %v2297_v19 }
 0x7b3   :  { %v663_v21 = vadd.f32 1.0, %v2299_v20  ;;  %vm767_vm10 = vmor %vm765_vm9, %vm766_vm8 }
 0x7b4   :  { %v762_v23 = vsub.f32 1.0, %v761_v22 }
 0x7b5   :  { %2300 = vrcp.f32 %v663_v21  ;;  %v675_v45 = vand.u32 2147483648, %v663_v21  ;;  %vm669_vm13 = vweird.f32 %v663_v21  ;;  %v673_v46 = vand.u32 2147483647, %v663_v21 }
 0x7b6   :  { %v763_v24 = vmul.f32 %v2297_v19, %v762_v23 }
 0x7b7   :  { %v676_v50 = vor.u32 1.1754944e-38, %v675_v45  ;;  %vm674_vm15 = vcmp.eq.f32.partialorder %v673_v46, 8.507059e+37 }
 0x7b8   :  { %v764_v26 = vadd.f32 %v2297_v19, %v763_v24 }
 0x7ba   :  { %v768_v33 = vsel %vm767_vm10, %v2297_v19, %v764_v26 }
 0x7bb   :  { %v2301_v25 = vpop.eup %2300  ;;  %v773_v41 = vsel %vm770_vm11, %v772_v34, %v768_v33 }
 0x7bc   :  { %v665_v28 = vmul.f32 %v2301_v25, %v663_v21  ;;  %vm670_vm12 = vweird.f32 %v2301_v25  ;;  %v776_v57 = vmul.f32 %v773_v41, %v2804_v44 }
 0x7bd   :  { %vm671_vm14 = vmor %vm669_vm13, %vm670_vm12 }
 0x7be   :  { %v666_v39 = vsub.f32 1.0, %v665_v28 }
 0x7c0   :  { %v667_v42 = vmul.f32 %v2301_v25, %v666_v39 }
 0x7c2   :  { %v668_v43 = vadd.f32 %v2301_v25, %v667_v42 }
 0x7c4   :  { %v672_v47 = vsel %vm671_vm14, %v2301_v25, %v668_v43 }
 0x7c5   :  { %v677_v52 = vsel %vm674_vm15, %v676_v50, %v672_v47 }
 0x7c6   :  { %v680_v61 = vmul.f32 %v677_v52, %v2814_v48 }
 0x7f5   :  { %v779_v40 = vpop.permute.xlu0 %778 }
 0x7f6   :  { %v781_v30 = vmul.f32 %v779_v40, %v773_v41 }
 0x7f8   :  { %783 = vrot.lane.b32.xlu2 %v781_v30, %s2601_s22 }
 0x800   :  { %515 = vrot.lane.b32.xlu2 %v508_v29, %s2601_s22 }
 0x802   :  { %v683_v51 = vpop.permute.xlu2 %682 }
 0x803   :  { %v685_v53 = vmul.f32 %v683_v51, %v677_v52 }
 0x805   :  { %687 = vrot.lane.b32.xlu1 %v685_v53, %s2601_s22 }
 0x852   :  { %v784_v58 = vpop.permute.xlu2 %783 }
 0x853   :  { %v2841_v59 = vadd.f32 %v784_v58, %v776_v57 }
 0x855   :  { %2302 = vtanh.f32 %v2841_v59 }
 0x85a   :  { %v516_v35 = vpop.permute.xlu2 %515 }
 0x85b   :  { %v2303_v60 = vpop.eup %2302  ;;  %1981 = vmatmul.msk.bf16.vlgmr.msrb.gmra.mxu0 %vm240_vm4, %v516_v35 }
 0x85c   :  { %789 = vrot.lane.b32.xlu1 %v2303_v60, %s2592_s13  ;;  %907 = vmatpush.bf16.msrb.mxu0 %v2710_v1 }
 0x860   :  { %908 = vmatpush.bf16.msrb.mxu0 %v2717_v3 }
 0x877   :  { %v688_v62 = vpop.permute.xlu1 %687 }
 0x878   :  { %v2847_v63 = vadd.f32 %v688_v62, %v680_v61 }
 0x87a   :  { %2304 = vtanh.f32 %v2847_v63 }
 0x880   :  { %v2305_v0 = vpop.eup %2304 }
 0x881   :  { %693 = vrot.lane.b32.xlu0 %v2305_v0, %s2592_s13 }
 0x8ce   :  { %v790_v44 = vpop.permute.xlu1 %789 }
 0x8cf   :  { %v792_v5 = vmul.f32 %v790_v44, %v773_v41 }
 0x8d1   :  { %794 = vrot.lane.b32.xlu0 %v792_v5, %s2601_s22  ;;  %v894_v6 = vpack.c.bf16 %v792_v5, %v792_v5 }
 0x8d8   :  { %v541_v8 = vpop.f32.mrf.mxu0 }
 0x8d9   :  { %896 = vrot.lane.b32.xlu0 %v894_v6, %s2601_s22  ;;  %v573_v21 = vadd.f32 %v2820_v54, %v541_v8 }
 0x8e0   :  { %v543_v9 = vpop.f32.mrf.mxu0 }
 0x8f3   :  { %v694_v10 = vpop.permute.xlu0 %693 }
 0x8f4   :  { %v696_v11 = vmul.f32 %v694_v10, %v677_v52 }
 0x8f6   :  { %v697_v48 = vpack.c.bf16 %v696_v11, %v696_v11  ;;  %798 = vrot.lane.b32.xlu1 %v696_v11, %s2592_s13 }
 0x8f8   :  { %704 = vrot.lane.b32.xlu2 %v697_v48, %s2601_s22 }
 0x8fe   :  { %205 = vperm.xlu1 %2232, %v2712_v2  }
 0x943   :  { %v795_v16 = vpop.permute.xlu0 %794 }
 0x94b   :  { %v897_v17 = vpop.permute.xlu0 %896 }
 0x952   :  { %v705_v15 = vpop.permute.xlu2 %704 }
 0x953   :  { %2003 = vmatmul.msk.bf16.vlgmr.msra.gmra.mxu0 %vm240_vm4, %v705_v15 }
 0x954   :  { %1128 = vmatpush.bf16.msra.mxu0 %v2736_v32 }
 0x958   :  { %1129 = vmatpush.bf16.msra.mxu0 %v2742_v36 }
 0x95c   :  { %1130 = vmatpush.bf16.msra.mxu0 %v2745_v37 }
 0x960   :  { %1131 = vmatpush.bf16.msra.mxu0 %v2750_v38 }
 0x963   :  { %2017 = vmatmul.msk.bf16.vlgmr.msrb.gmra.mxu0 %vm240_vm4, %v897_v17 }
 0x968   :  { %v799_v18 = vpop.permute.xlu1 %798 }
 0x969   :  { %v801_v19 = vsel %vm240_vm4, %v795_v16, %v799_v18 }
 0x96a   :  { %v802_v20 = vpack.c.bf16 %v801_v19, %v801_v19 }
 0x96c   :  { %2006 = vmatmul.msk.bf16.vlgmr.msra.gmra.mxu1 %vm328_vm5, %v802_v20 }
 0x970   :  { %v206_v24 = vpop.permute.xlu1 %205 }
 0x971   :  { %v208_v26 = vmul.f32 %v2724_v4, %v206_v24 }
 0x973   :  { %v209_v27 = vadd.f32 %v2727_v7, %v208_v26 }
 0x9d0   :  { %v730_v22 = vpop.f32.mrf.mxu0 }
 0x9d1   :  { %v2867_v23 = vadd.f32 %v730_v22, %v573_v21  ;;  %v2180_v22 = vld [vmem:[#allocation10 + $0x38] sm:$0xff] }
 0x9d2   :  { %886 = vmatpush.bf16.msra.mxu3 %v2180_v22 }
 0x9d8   :  { %v732_v25 = vpop.f32.mrf.mxu0 }
 0x9e0   :  { %v910_v28 = vpop.f32.mrf.mxu0 }
 0x9e1   :  { %v914_v31 = vadd.f32 %v910_v28, %v209_v27 }
 0x9e3   :  { %2306 = vtanh.f32 %v914_v31  ;;  %v2018_v45 = vmul.f32 -1.442695, %v914_v31  ;;  %v2606_v31 = vmov 5  }
 0x9e4   :  { %2233 = vset.pattern.permute.xlu0 %v2606_v31 }
 0x9e8   :  { %v912_v33 = vpop.f32.mrf.mxu0 }
 0x9e9   :  { %v2307_v34 = vpop.eup %2306  ;;  %v815_v39 = vpop.f32.mrf.mxu1 }
 0x9ea   :  { %v816_v40 = vadd.f32 %v2770_v49, %v815_v39  ;;  %937 = vrot.lane.b32.xlu0 %v2307_v34, %s2592_s13 }
 0x9ec   :  { %2308 = vtanh.f32 %v816_v40  ;;  %v2007_v30 = vmul.f32 -1.442695, %v816_v40 }
 0x9ee   :  { %2310 = vpow2.f32 %v2007_v30 }
 0x9f1   :  { %v817_v54 = vpop.f32.mrf.mxu1 }
 0x9f2   :  { %v2309_v41 = vpop.eup %2308 }
 0x9f3   :  { %841 = vrot.lane.b32.xlu2 %v2309_v41, %s2592_s13 }
 0x9f4   :  { %v2311_v42 = vpop.eup %2310 }
 0x9f5   :  { %v822_v43 = vadd.f32 1.0, %v2311_v42 }
 0x9f7   :  { %2312 = vrcp.f32 %v822_v43  ;;  %v834_v56 = vand.u32 2147483648, %v822_v43  ;;  %vm828_vm1 = vweird.f32 %v822_v43  ;;  %v832_v57 = vand.u32 2147483647, %v822_v43 }
 0x9f8   :  { %2314 = vpow2.f32 %v2018_v45 }
 0x9f9   :  { %v835_v60 = vor.u32 1.1754944e-38, %v834_v56  ;;  %vm833_vm3 = vcmp.eq.f32.partialorder %v832_v57, 8.507059e+37 }
 0x9fd   :  { %v2313_v46 = vpop.eup %2312 }
 0x9fe   :  { %v2315_v29 = vpop.eup %2314  ;;  %v824_v47 = vmul.f32 %v2313_v46, %v822_v43  ;;  %vm829_vm0 = vweird.f32 %v2313_v46 }
 0x9ff   :  { %v918_v50 = vadd.f32 1.0, %v2315_v29  ;;  %vm830_vm2 = vmor %vm828_vm1, %vm829_vm0 }
 0xa00   :  { %v825_v51 = vsub.f32 1.0, %v824_v47 }
 0xa01   :  { %2316 = vrcp.f32 %v918_v50  ;;  %v930_v8 = vand.u32 2147483648, %v918_v50  ;;  %vm924_vm7 = vweird.f32 %v918_v50  ;;  %v928_v9 = vand.u32 2147483647, %v918_v50 }
 0xa02   :  { %v826_v52 = vmul.f32 %v2313_v46, %v825_v51 }
 0xa03   :  { %v931_v11 = vor.u32 1.1754944e-38, %v930_v8  ;;  %vm929_vm9 = vcmp.eq.f32.partialorder %v928_v9, 8.507059e+37 }
 0xa04   :  { %v827_v55 = vadd.f32 %v2313_v46, %v826_v52 }
 0xa06   :  { %v831_v35 = vsel %vm830_vm2, %v2313_v46, %v827_v55 }
 0xa07   :  { %v2317_v53 = vpop.eup %2316  ;;  %v836_v62 = vsel %vm833_vm3, %v835_v60, %v831_v35 }
 0xa08   :  { %v920_v58 = vmul.f32 %v2317_v53, %v918_v50  ;;  %vm925_vm6 = vweird.f32 %v2317_v53  ;;  %v839_v17 = vmul.f32 %v836_v62, %v2847_v63 }
 0xa09   :  { %vm926_vm8 = vmor %vm924_vm7, %vm925_vm6 }
 0xa0a   :  { %v921_v0 = vsub.f32 1.0, %v920_v58 }
 0xa0c   :  { %v922_v5 = vmul.f32 %v2317_v53, %v921_v0 }
 0xa0e   :  { %v923_v6 = vadd.f32 %v2317_v53, %v922_v5 }
 0xa10   :  { %v927_v10 = vsel %vm926_vm8, %v2317_v53, %v923_v6 }
 0xa11   :  { %v932_v12 = vsel %vm929_vm9, %v931_v11, %v927_v10 }
 0xa12   :  { %v935_v14 = vmul.f32 %v932_v12, %v2841_v59  ;;  %v2179_v59 = vld [vmem:[#allocation10 + $0x30] sm:$0xff] }
 0xa13   :  { %887 = vmatpush.bf16.msra.mxu3 %v2179_v59 }
 0xa17   :  { %1066 = vmatpush.bf16.msrb.mxu3 %v2710_v1 }
 0xa1b   :  { %1067 = vmatpush.bf16.msrb.mxu3 %v2717_v3 }
 0xa4d   :  { %v842_v61 = vpop.permute.xlu2 %841 }
 0xa4e   :  { %v844_v44 = vmul.f32 %v842_v61, %v836_v62 }
 0xa50   :  { %846 = vrot.lane.b32.xlu1 %v844_v44, %s2601_s22 }
 0xa5c   :  { %v938_v48 = vpop.permute.xlu0 %937 }
 0xa5d   :  { %v940_v13 = vmul.f32 %v938_v48, %v932_v12 }
 0xa5f   :  { %942 = vrot.lane.b32.xlu2 %v940_v13, %s2601_s22 }
 0xab9   :  { %v943_v15 = vpop.permute.xlu2 %942 }
 0xaba   :  { %v2877_v16 = vadd.f32 %v943_v15, %v935_v14 }
 0xabc   :  { %2318 = vtanh.f32 %v2877_v16 }
 0xac2   :  { %v2319_v18 = vpop.eup %2318  ;;  %v847_v19 = vpop.permute.xlu1 %846 }
 0xac3   :  { %v2881_v20 = vadd.f32 %v847_v19, %v839_v17  ;;  %948 = vrot.lane.b32.xlu1 %v2319_v18, %s2592_s13 }
 0xac5   :  { %2320 = vtanh.f32 %v2881_v20 }
 0xacb   :  { %v2321_v21 = vpop.eup %2320 }
 0xacc   :  { %852 = vrot.lane.b32.xlu0 %v2321_v21, %s2592_s13 }
 0xb35   :  { %v949_v24 = vpop.permute.xlu1 %948 }
 0xb36   :  { %v951_v25 = vmul.f32 %v949_v24, %v932_v12 }
 0xb38   :  { %953 = vrot.lane.b32.xlu0 %v951_v25, %s2601_s22  ;;  %v1053_v28 = vpack.c.bf16 %v951_v25, %v951_v25 }
 0xb3e   :  { %v853_v63 = vpop.permute.xlu0 %852 }
 0xb3f   :  { %v855_v26 = vmul.f32 %v853_v63, %v836_v62 }
 0xb40   :  { %211 = vperm.xlu0 %2233, %v2712_v2  }
 0xb41   :  { %v856_v27 = vpack.c.bf16 %v855_v26, %v855_v26  ;;  %957 = vrot.lane.b32.xlu1 %v855_v26, %s2592_s13 }
 0xb43   :  { %863 = vrot.lane.b32.xlu2 %v856_v27, %s2601_s22 }
 0xb4b   :  { %1055 = vrot.lane.b32.xlu2 %v1053_v28, %s2601_s22 }
 0xb9d   :  { %v864_v1 = vpop.permute.xlu2 %863 }
 0xb9e   :  { %2016 = vmatmul.msk.bf16.vlgmr.msra.gmra.mxu3 %vm240_vm4, %v864_v1 }
 0xb9f   :  { %1287 = vmatpush.bf16.msra.mxu3 %v2736_v32 }
 0xba3   :  { %1288 = vmatpush.bf16.msra.mxu3 %v2742_v36 }
 0xba5   :  { %v1056_v3 = vpop.permute.xlu2 %1055 }
 0xba7   :  { %1289 = vmatpush.bf16.msra.mxu3 %v2745_v37 }
 0xbaa   :  { %v954_v33 = vpop.permute.xlu0 %953 }
 0xbab   :  { %1290 = vmatpush.bf16.msra.mxu3 %v2750_v38 }
 0xbae   :  { %2030 = vmatmul.msk.bf16.vlgmr.msrb.gmra.mxu3 %vm240_vm4, %v1056_v3  ;;  %v2181_v3 = vld [vmem:[#allocation10 + $0x40] sm:$0xff] }
 0xbb2   :  { %v212_v32 = vpop.permute.xlu0 %211 }
 0xbb3   :  { %v958_v34 = vpop.permute.xlu1 %957  ;;  %v214_v37 = vmul.f32 %v2724_v4, %v212_v32 }
 0xbb4   :  { %v960_v39 = vsel %vm240_vm4, %v954_v33, %v958_v34  ;;  %v2928_v33 = vld [vmem:[%s3060_s3 + $0x8] sm:$0xff]  ;;  %v2934_v34 = vld [vmem:[%s3060_s3] sm:$0xff] }
 0xbb5   :  { %v961_v40 = vpack.c.bf16 %v960_v39, %v960_v39  ;;  %v215_v38 = vadd.f32 %v2727_v7, %v214_v37  ;;  %v2607_v39 = vmov 6  }
 0xbb6   :  { %2234 = vset.pattern.permute.xlu0 %v2607_v39 }
 0xbb7   :  { %2019 = vmatmul.msk.bf16.vlgmr.msrb.gmra.mxu2 %vm328_vm5, %v961_v40  ;;  %v2937_v40 = vld [vmem:[#allocation2] sm:$0xff] }
 0xc21   :  { %v889_v2 = vpop.f32.mrf.mxu3 }
 0xc22   :  { %v2902_v54 = vadd.f32 %v889_v2, %v2867_v23 }
 0xc29   :  { %v891_v36 = vpop.f32.mrf.mxu3 }
 0xc31   :  { %v1069_v41 = vpop.f32.mrf.mxu3 }
 0xc32   :  { %v1073_v30 = vadd.f32 %v1069_v41, %v215_v38  ;;  %v2381_v41 = vld [vmem:[#allocation7 + $0x18] sm:$0xff] }
 0xc34   :  { %2322 = vtanh.f32 %v1073_v30  ;;  %v2031_v47 = vmul.f32 -1.442695, %v1073_v30  ;;  %v2382_v30 = vld [vmem:[#allocation7 + $0x10] sm:$0xff] }
 0xc39   :  { %v1071_v42 = vpop.f32.mrf.mxu3 }
 0xc3a   :  { %v2323_v43 = vpop.eup %2322  ;;  %v974_v45 = vpop.f32.mrf.mxu2  ;;  %v2383_v42 = vld [vmem:[#allocation7 + $0x8] sm:$0xff] }
 0xc3b   :  { %v975_v46 = vadd.f32 %v2770_v49, %v974_v45  ;;  %1096 = vrot.lane.b32.xlu2 %v2323_v43, %s2592_s13  ;;  %v2384_v43 = vld [vmem:[#allocation7] sm:$0xff] }
 0xc3d   :  { %2324 = vtanh.f32 %v975_v46  ;;  %v2020_v53 = vmul.f32 -1.442695, %v975_v46 }
 0xc3e   :  { %2326 = vpow2.f32 %v2031_v47  ;;  %v2947_v47 = vld [vmem:[#allocation9] ss:$0 sm:$0xff] }
 0xc42   :  { %v976_v29 = vpop.f32.mrf.mxu2 }
 0xc43   :  { %v2325_v23 = vpop.eup %2324 }
 0xc44   :  { %1000 = vrot.lane.b32.xlu1 %v2325_v23, %s2592_s13  ;;  %v2327_v4 = vpop.eup %2326 }
 0xc45   :  { %v1077_v50 = vadd.f32 1.0, %v2327_v4 }
 0xc47   :  { %2328 = vrcp.f32 %v1077_v50  ;;  %v1089_v49 = vand.u32 2147483648, %v1077_v50  ;;  %vm1083_vm11 = vweird.f32 %v1077_v50  ;;  %v1087_v57 = vand.u32 2147483647, %v1077_v50 }
 0xc48   :  { %2330 = vpow2.f32 %v2020_v53 }
 0xc49   :  { %v1090_v60 = vor.u32 1.1754944e-38, %v1089_v49  ;;  %vm1088_vm13 = vcmp.eq.f32.partialorder %v1087_v57, 8.507059e+37 }
 0xc4d   :  { %v2329_v7 = vpop.eup %2328 }
 0xc4e   :  { %v1079_v51 = vmul.f32 %v2329_v7, %v1077_v50  ;;  %vm1084_vm10 = vweird.f32 %v2329_v7  ;;  %v2331_v35 = vpop.eup %2330 }
 0xc4f   :  { %vm1085_vm12 = vmor %vm1083_vm11, %vm1084_vm10  ;;  %v981_v0 = vadd.f32 1.0, %v2331_v35 }
 0xc50   :  { %v1080_v52 = vsub.f32 1.0, %v1079_v51 }
 0xc51   :  { %2332 = vrcp.f32 %v981_v0  ;;  %v993_v11 = vand.u32 2147483648, %v981_v0  ;;  %vm987_vm15 = vweird.f32 %v981_v0  ;;  %v991_v48 = vand.u32 2147483647, %v981_v0 }
 0xc52   :  { %v1081_v55 = vmul.f32 %v2329_v7, %v1080_v52  ;;  %v2950_v52 = vld [vmem:[#allocation4] ss:$0 sm:$0xff] }
 0xc53   :  { %v994_v13 = vor.u32 1.1754944e-38, %v993_v11  ;;  %vm992_vm1 = vcmp.eq.f32.partialorder %v991_v48, 8.507059e+37 }
 0xc54   :  { %v1082_v56 = vadd.f32 %v2329_v7, %v1081_v55 }
 0xc56   :  { %v1086_v58 = vsel %vm1085_vm12, %v2329_v7, %v1082_v56  ;;  %v2954_v56 = vld [vmem:[#allocation6] ss:$0 sm:$0xff] }
 0xc57   :  { %v1091_v62 = vsel %vm1088_vm13, %v1090_v60, %v1086_v58  ;;  %v2333_v5 = vpop.eup %2332 }
 0xc58   :  { %v983_v6 = vmul.f32 %v2333_v5, %v981_v0  ;;  %vm988_vm14 = vweird.f32 %v2333_v5  ;;  %v1094_v18 = vmul.f32 %v1091_v62, %v2877_v16 }
 0xc59   :  { %vm989_vm0 = vmor %vm987_vm15, %vm988_vm14 }
 0xc5a   :  { %v984_v8 = vsub.f32 1.0, %v983_v6 }
 0xc5c   :  { %v985_v9 = vmul.f32 %v2333_v5, %v984_v8 }
 0xc5e   :  { %v986_v10 = vadd.f32 %v2333_v5, %v985_v9 }
 0xc60   :  { %v990_v12 = vsel %vm989_vm0, %v2333_v5, %v986_v10 }
 0xc61   :  { %v995_v15 = vsel %vm992_vm1, %v994_v13, %v990_v12 }
 0xc62   :  { %v998_v59 = vmul.f32 %v995_v15, %v2881_v20  ;;  %v2182_v20 = vld [vmem:[#allocation10 + $0x48] sm:$0xff] }
 0xc63   :  { %1045 = vmatpush.bf16.msrb.mxu1 %v2182_v20 }
 0xc67   :  { %1046 = vmatpush.bf16.msrb.mxu1 %v2181_v3 }
 0xc6b   :  { %1225 = vmatpush.bf16.msra.mxu1 %v2928_v33 }
 0xc6f   :  { %1226 = vmatpush.bf16.msra.mxu1 %v2934_v34 }
 0xc95   :  { %v1097_v61 = vpop.permute.xlu2 %1096 }
 0xc96   :  { %v1099_v44 = vmul.f32 %v1097_v61, %v1091_v62 }
 0xc98   :  { %1101 = vrot.lane.b32.xlu2 %v1099_v44, %s2601_s22 }
 0xcb6   :  { %v1001_v14 = vpop.permute.xlu1 %1000 }
 0xcb7   :  { %v1003_v17 = vmul.f32 %v1001_v14, %v995_v15 }
 0xcb9   :  { %1005 = vrot.lane.b32.xlu1 %v1003_v17, %s2601_s22 }
 0xcf2   :  { %v1102_v19 = vpop.permute.xlu2 %1101 }
 0xcf3   :  { %v2912_v21 = vadd.f32 %v1102_v19, %v1094_v18 }
 0xcf5   :  { %2334 = vtanh.f32 %v2912_v21 }
 0xcfb   :  { %v2335_v22 = vpop.eup %2334 }
 0xcfc   :  { %1107 = vrot.lane.b32.xlu1 %v2335_v22, %s2592_s13 }
 0xd2b   :  { %v1006_v24 = vpop.permute.xlu1 %1005 }
 0xd2c   :  { %v2917_v25 = vadd.f32 %v1006_v24, %v998_v59 }
 0xd2e   :  { %2336 = vtanh.f32 %v2917_v25 }
 0xd34   :  { %v2337_v63 = vpop.eup %2336 }
 0xd35   :  { %1011 = vrot.lane.b32.xlu0 %v2337_v63, %s2592_s13 }
 0xd6e   :  { %v1108_v26 = vpop.permute.xlu1 %1107 }
 0xd6f   :  { %v1110_v16 = vmul.f32 %v1108_v26, %v1091_v62 }
 0xd71   :  { %1112 = vrot.lane.b32.xlu2 %v1110_v16, %s2601_s22  ;;  %v1212_v27 = vpack.c.bf16 %v1110_v16, %v1110_v16 }
 0xd79   :  { %1214 = vrot.lane.b32.xlu2 %v1212_v27, %s2601_s22 }
 0xda7   :  { %v1012_v28 = vpop.permute.xlu0 %1011 }
 0xda8   :  { %v1014_v31 = vmul.f32 %v1012_v28, %v995_v15 }
 0xdaa   :  { %v1015_v1 = vpack.c.bf16 %v1014_v31, %v1014_v31  ;;  %1116 = vrot.lane.b32.xlu0 %v1014_v31, %s2592_s13 }
 0xdac   :  { %1022 = vrot.lane.b32.xlu1 %v1015_v1, %s2601_s22 }
 0xdb2   :  { %217 = vperm.xlu0 %2234, %v2937_v40  }
 0xdcb   :  { %v1113_v2 = vpop.permute.xlu2 %1112 }
 0xdd3   :  { %v1215_v45 = vpop.permute.xlu2 %1214 }
 0xe1c   :  { %v1117_v32 = vpop.permute.xlu0 %1116 }
 0xe1d   :  { %v1119_v36 = vsel %vm240_vm4, %v1113_v2, %v1117_v32 }
 0xe1e   :  { %v1120_v37 = vpack.c.bf16 %v1119_v36, %v1119_v36  ;;  %v1023_v38 = vpop.permute.xlu1 %1022 }
 0xe1f   :  { %2029 = vmatmul.msk.bf16.vlgmr.msrb.gmra.mxu1 %vm240_vm4, %v1023_v38 }
 0xe20   :  { %2032 = vmatmul.msk.bf16.vlgmr.msra.gmra.mxu0 %vm328_vm5, %v1120_v37  ;;  %1446 = vmatpush.bf16.msrb.mxu1 %v2381_v41 }
 0xe24   :  { %1447 = vmatpush.bf16.msrb.mxu1 %v2382_v30  ;;  %v218_v50 = vpop.permute.xlu0 %217 }
 0xe25   :  { %v220_v53 = vmul.f32 %v2950_v52, %v218_v50 }
 0xe28   :  { %1448 = vmatpush.bf16.msrb.mxu1 %v2383_v42 }
 0xe2c   :  { %1449 = vmatpush.bf16.msrb.mxu1 %v2384_v43 }
 0xe2f   :  { %2043 = vmatmul.msk.bf16.vlgmr.msra.gmra.mxu1 %vm240_vm4, %v1215_v45 }
 0xe9c   :  { %v1048_v46 = vpop.f32.mrf.mxu1 }
 0xe9d   :  { %v2945_v29 = vadd.f32 %v1048_v46, %v2902_v54  ;;  %v1133_v23 = vpop.f32.mrf.mxu0  ;;  %v221_v54 = vadd.f32 %v2954_v56, %v220_v53  ;;  %v2184_v46 = vld [vmem:[#allocation10 + $0x58] sm:$0xff] }
 0xe9e   :  { %v1134_v4 = vadd.f32 %v2947_v47, %v1133_v23  ;;  %1204 = vmatpush.bf16.msra.mxu2 %v2184_v46  ;;  %v2183_v23 = vld [vmem:[#allocation10 + $0x50] sm:$0xff] }
 0xea0   :  { %2338 = vtanh.f32 %v1134_v4  ;;  %v2033_v61 = vmul.f32 -1.442695, %v1134_v4  ;;  %v2608_v4 = vmov 7  }
 0xea1   :  { %2235 = vset.pattern.permute.xlu0 %v2608_v4 }
 0xea2   :  { %1205 = vmatpush.bf16.msra.mxu2 %v2183_v23 }
 0xea4   :  { %v1050_v7 = vpop.f32.mrf.mxu1 }
 0xea5   :  { %v1135_v51 = vpop.f32.mrf.mxu0 }
 0xea6   :  { %v2339_v55 = vpop.eup %2338  ;;  %1384 = vmatpush.bf16.msrb.mxu2 %v2928_v33 }
 0xea7   :  { %1159 = vrot.lane.b32.xlu1 %v2339_v55, %s2592_s13 }
 0xeaa   :  { %1385 = vmatpush.bf16.msrb.mxu2 %v2934_v34 }
 0xeac   :  { %v1228_v49 = vpop.f32.mrf.mxu1 }
 0xead   :  { %v1232_v57 = vadd.f32 %v1228_v49, %v221_v54 }
 0xeaf   :  { %2340 = vtanh.f32 %v1232_v57  ;;  %v2044_v60 = vmul.f32 -1.442695, %v1232_v57 }
 0xeb1   :  { %2342 = vpow2.f32 %v2044_v60 }
 0xeb2   :  { %2344 = vpow2.f32 %v2033_v61 }
 0xeb4   :  { %v1230_v58 = vpop.f32.mrf.mxu1 }
 0xeb5   :  { %v2341_v35 = vpop.eup %2340 }
 0xeb6   :  { %1255 = vrot.lane.b32.xlu2 %v2341_v35, %s2592_s13 }
 0xeb7   :  { %v2343_v62 = vpop.eup %2342 }
 0xeb8   :  { %v1236_v0 = vadd.f32 1.0, %v2343_v62  ;;  %v2345_v44 = vpop.eup %2344 }
 0xeb9   :  { %v1140_v5 = vadd.f32 1.0, %v2345_v44 }
 0xeba   :  { %2346 = vrcp.f32 %v1236_v0  ;;  %v1248_v13 = vand.u32 2147483648, %v1236_v0  ;;  %vm1242_vm3 = vweird.f32 %v1236_v0  ;;  %v1246_v15 = vand.u32 2147483647, %v1236_v0 }
 0xebb   :  { %2348 = vrcp.f32 %v1140_v5  ;;  %v1152_v26 = vand.u32 2147483648, %v1140_v5  ;;  %vm1146_vm9 = vweird.f32 %v1140_v5  ;;  %v1150_v16 = vand.u32 2147483647, %v1140_v5 }
 0xebc   :  { %v1249_v18 = vor.u32 1.1754944e-38, %v1248_v13  ;;  %vm1247_vm7 = vcmp.eq.f32.partialorder %v1246_v15, 8.507059e+37 }
 0xebd   :  { %v1153_v28 = vor.u32 1.1754944e-38, %v1152_v26  ;;  %vm1151_vm11 = vcmp.eq.f32.partialorder %v1150_v16, 8.507059e+37 }
 0xec0   :  { %v2347_v6 = vpop.eup %2346 }
 0xec1   :  { %v1238_v8 = vmul.f32 %v2347_v6, %v1236_v0  ;;  %v2349_v10 = vpop.eup %2348  ;;  %vm1243_vm2 = vweird.f32 %v2347_v6 }
 0xec2   :  { %v1142_v48 = vmul.f32 %v2349_v10, %v1140_v5  ;;  %vm1244_vm6 = vmor %vm1242_vm3, %vm1243_vm2  ;;  %vm1147_vm8 = vweird.f32 %v2349_v10 }
 0xec3   :  { %v1239_v9 = vsub.f32 1.0, %v1238_v8  ;;  %vm1148_vm10 = vmor %vm1146_vm9, %vm1147_vm8  ;;  %vm1931_vm9 = vcmask 31744  }
 0xec4   :  { %v1143_v14 = vsub.f32 1.0, %v1142_v48 }
 0xec5   :  { %v1240_v11 = vmul.f32 %v2347_v6, %v1239_v9 }
 0xec6   :  { %v1144_v19 = vmul.f32 %v2349_v10, %v1143_v14 }
 0xec7   :  { %v1241_v12 = vadd.f32 %v2347_v6, %v1240_v11 }
 0xec8   :  { %v1145_v63 = vadd.f32 %v2349_v10, %v1144_v19 }
 0xec9   :  { %v1245_v17 = vsel %vm1244_vm6, %v2347_v6, %v1241_v12 }
 0xeca   :  { %v1250_v59 = vsel %vm1247_vm7, %v1249_v18, %v1245_v17  ;;  %v1149_v27 = vsel %vm1148_vm10, %v2349_v10, %v1145_v63 }
 0xecb   :  { %v1154_v31 = vsel %vm1151_vm11, %v1153_v28, %v1149_v27  ;;  %v1253_v3 = vmul.f32 %v1250_v59, %v2912_v21 }
 0xecc   :  { %v1157_v36 = vmul.f32 %v1154_v31, %v2917_v25 }
 0xf10   :  { %v1256_v22 = vpop.permute.xlu2 %1255 }
 0xf11   :  { %v1258_v24 = vmul.f32 %v1256_v22, %v1250_v59 }
 0xf13   :  { %1260 = vrot.lane.b32.xlu2 %v1258_v24, %s2601_s22 }
 0xf19   :  { %v1160_v1 = vpop.permute.xlu1 %1159 }
 0xf1a   :  { %v1162_v20 = vmul.f32 %v1160_v1, %v1154_v31 }
 0xf1c   :  { %1164 = vrot.lane.b32.xlu1 %v1162_v20, %s2601_s22 }
 0xf6d   :  { %v1261_v39 = vpop.permute.xlu2 %1260 }
 0xf6e   :  { %v2961_v2 = vadd.f32 %v1261_v39, %v1253_v3 }
 0xf70   :  { %2350 = vtanh.f32 %v2961_v2 }
 0xf76   :  { %v2351_v32 = vpop.eup %2350 }
 0xf77   :  { %1266 = vrot.lane.b32.xlu1 %v2351_v32, %s2592_s13 }
 0xf8e   :  { %v1165_v37 = vpop.permute.xlu1 %1164 }
 0xf8f   :  { %v2966_v38 = vadd.f32 %v1165_v37, %v1157_v36 }
 0xf91   :  { %2352 = vtanh.f32 %v2966_v38 }
 0xf97   :  { %v2353_v41 = vpop.eup %2352 }
 0xf98   :  { %1170 = vrot.lane.b32.xlu0 %v2353_v41, %s2592_s13 }
 0xfe9   :  { %v1267_v30 = vpop.permute.xlu1 %1266 }
 0xfea   :  { %v1269_v21 = vmul.f32 %v1267_v30, %v1250_v59 }
 0xfec   :  { %1271 = vrot.lane.b32.xlu0 %v1269_v21, %s2601_s22  ;;  %v1371_v25 = vpack.c.bf16 %v1269_v21, %v1269_v21 }
 0xff4   :  { %223 = vperm.xlu0 %2235, %v2937_v40  }
0x100a   :  { %v1171_v42 = vpop.permute.xlu0 %1170 }
0x100b   :  { %v1173_v43 = vmul.f32 %v1171_v42, %v1154_v31 }
0x100d   :  { %v1174_v45 = vpack.c.bf16 %v1173_v43, %v1173_v43  ;;  %1275 = vrot.lane.b32.xlu1 %v1173_v43, %s2592_s13 }
0x100f   :  { %1181 = vrot.lane.b32.xlu2 %v1174_v45, %s2601_s22 }
0x1017   :  { %1373 = vrot.lane.b32.xlu2 %v1371_v25, %s2601_s22 }
0x105e   :  { %v1272_v51 = vpop.permute.xlu0 %1271 }
0x1066   :  { %v224_v49 = vpop.permute.xlu0 %223 }
0x1067   :  { %v226_v40 = vmul.f32 %v2950_v52, %v224_v49 }
0x1069   :  { %v1182_v50 = vpop.permute.xlu2 %1181  ;;  %v227_v58 = vadd.f32 %v2954_v56, %v226_v40 }
0x106a   :  { %2042 = vmatmul.msk.bf16.vlgmr.msra.gmra.mxu2 %vm240_vm4, %v1182_v50 }
0x1071   :  { %v1374_v7 = vpop.permute.xlu2 %1373 }
0x107a   :  { %2056 = vmatmul.msk.bf16.vlgmr.msrb.gmra.mxu2 %vm240_vm4, %v1374_v7 }
0x107f   :  { %v1276_v53 = vpop.permute.xlu1 %1275 }
0x1080   :  { %v1278_v55 = vsel %vm240_vm4, %v1272_v51, %v1276_v53 }
0x1081   :  { %v1279_v54 = vpack.c.bf16 %v1278_v55, %v1278_v55 }
0x1083   :  { %2045 = vmatmul.msk.bf16.vlgmr.msra.gmra.mxu3 %vm328_vm5, %v1279_v54 }
0x10ed   :  { %v1207_v33 = vpop.f32.mrf.mxu2 }
0x10ee   :  { %v2982_v34 = vadd.f32 %v1207_v33, %v2945_v29 }
0x10f5   :  { %v1209_v57 = vpop.f32.mrf.mxu2 }
0x10fd   :  { %v1387_v35 = vpop.f32.mrf.mxu2 }
0x10fe   :  { %v1391_v60 = vadd.f32 %v1387_v35, %v227_v58 }
0x1100   :  { %2354 = vtanh.f32 %v1391_v60  ;;  %v2057_v6 = vmul.f32 -1.442695, %v1391_v60 }
0x1105   :  { %v1389_v61 = vpop.f32.mrf.mxu2 }
0x1106   :  { %v2355_v62 = vpop.eup %2354  ;;  %v1292_v0 = vpop.f32.mrf.mxu3 }
0x1107   :  { %v1293_v44 = vadd.f32 %v2947_v47, %v1292_v0  ;;  %1414 = vrot.lane.b32.xlu2 %v2355_v62, %s2592_s13 }
0x1109   :  { %2356 = vtanh.f32 %v1293_v44  ;;  %v2046_v11 = vmul.f32 -1.442695, %v1293_v44 }
0x110a   :  { %2358 = vpow2.f32 %v2057_v6 }
0x110e   :  { %v1294_v5 = vpop.f32.mrf.mxu3 }
0x110f   :  { %v2357_v29 = vpop.eup %2356 }
0x1110   :  { %1318 = vrot.lane.b32.xlu1 %v2357_v29, %s2592_s13  ;;  %v2359_v52 = vpop.eup %2358 }
0x1111   :  { %v1395_v8 = vadd.f32 1.0, %v2359_v52 }
0x1113   :  { %2360 = vrcp.f32 %v1395_v8  ;;  %v1407_v13 = vand.u32 2147483648, %v1395_v8  ;;  %vm1401_vm13 = vweird.f32 %v1395_v8  ;;  %v1405_v14 = vand.u32 2147483647, %v1395_v8 }
0x1114   :  { %2362 = vpow2.f32 %v2046_v11 }
0x1115   :  { %v1408_v18 = vor.u32 1.1754944e-38, %v1407_v13  ;;  %vm1406_vm15 = vcmp.eq.f32.partialorder %v1405_v14, 8.507059e+37  ;;  %v2188_v14 = vld [vmem:[#allocation10 + $0x78] sm:$0xff] }
0x1116   :  { %1522 = vmatpush.bf16.msrb.mxu3 %v2188_v14 }
0x1119   :  { %v2361_v56 = vpop.eup %2360 }
0x111a   :  { %v1397_v9 = vmul.f32 %v2361_v56, %v1395_v8  ;;  %vm1402_vm12 = vweird.f32 %v2361_v56  ;;  %v2363_v17 = vpop.eup %2362 }
0x111b   :  { %vm1403_vm14 = vmor %vm1401_vm13, %vm1402_vm12  ;;  %v1299_v59 = vadd.f32 1.0, %v2363_v17 }
0x111c   :  { %v1398_v10 = vsub.f32 1.0, %v1397_v9  ;;  %v2185_v9 = vld [vmem:[#allocation10 + $0x60] sm:$0xff] }
0x111d   :  { %2364 = vrcp.f32 %v1299_v59  ;;  %v1311_v31 = vand.u32 2147483648, %v1299_v59  ;;  %vm1305_vm1 = vweird.f32 %v1299_v59  ;;  %v1309_v1 = vand.u32 2147483647, %v1299_v59 }
0x111e   :  { %v1399_v48 = vmul.f32 %v2361_v56, %v1398_v10 }
0x111f   :  { %v1312_v3 = vor.u32 1.1754944e-38, %v1311_v31  ;;  %vm1310_vm3 = vcmp.eq.f32.partialorder %v1309_v1, 8.507059e+37  ;;  %v2239_v31 = vld [vmem:[#allocation12] ss:$0 sm:$0xff] }
0x1120   :  { %v1400_v12 = vadd.f32 %v2361_v56, %v1399_v48 }
0x1122   :  { %v1404_v15 = vsel %vm1403_vm14, %v2361_v56, %v1400_v12  ;;  %v2186_v56 = vld [vmem:[#allocation10 + $0x68] sm:$0xff] }
0x1123   :  { %v1409_v22 = vsel %vm1406_vm15, %v1408_v18, %v1404_v15  ;;  %v2365_v63 = vpop.eup %2364  ;;  %1363 = vmatpush.bf16.msrb.mxu0 %v2186_v56  ;;  %v2187_v15 = vld [vmem:[#allocation10 + $0x70] sm:$0xff] }
0x1124   :  { %v1301_v26 = vmul.f32 %v2365_v63, %v1299_v59  ;;  %vm1306_vm0 = vweird.f32 %v2365_v63  ;;  %v1412_v37 = vmul.f32 %v1409_v22, %v2961_v2  ;;  %1523 = vmatpush.bf16.msrb.mxu3 %v2187_v15 }
0x1125   :  { %vm1307_vm2 = vmor %vm1305_vm1, %vm1306_vm0 }
0x1126   :  { %v1302_v16 = vsub.f32 1.0, %v1301_v26 }
0x1127   :  { %1364 = vmatpush.bf16.msrb.mxu0 %v2185_v9 }
0x1128   :  { %v1303_v27 = vmul.f32 %v2365_v63, %v1302_v16  ;;  %v2189_v16 = vld [vmem:[#allocation13] sm:$0xff] }
0x112a   :  { %v1304_v28 = vadd.f32 %v2365_v63, %v1303_v27  ;;  %v2192_v27 = vld [vmem:[#allocation13 + $0x18] sm:$0xff] }
0x112b   :  { %1606 = vmatpush.bf16.msra.mxu2 %v2192_v27 }
0x112c   :  { %v1308_v20 = vsel %vm1307_vm2, %v2365_v63, %v1304_v28  ;;  %v2190_v63 = vld [vmem:[#allocation13 + $0x8] sm:$0xff]  ;;  %v2191_v28 = vld [vmem:[#allocation13 + $0x10] sm:$0xff] }
0x112d   :  { %v1313_v32 = vsel %vm1310_vm3, %v1312_v3, %v1308_v20  ;;  %1566 = vmatpush.bf16.msra.mxu0 %v2190_v63 }
0x112e   :  { %v1316_v42 = vmul.f32 %v1313_v32, %v2966_v38 }
0x112f   :  { %1607 = vmatpush.bf16.msra.mxu2 %v2191_v28  ;;  %v2208_v28 = vld [vmem:[%s3067_s10 + $0x8] sm:$0xff] }
0x1131   :  { %1567 = vmatpush.bf16.msra.mxu0 %v2189_v16 }
0x1161   :  { %v1415_v19 = vpop.permute.xlu2 %1414 }
0x1162   :  { %v1417_v24 = vmul.f32 %v1415_v19, %v1409_v22 }
0x1164   :  { %1419 = vrot.lane.b32.xlu2 %v1417_v24, %s2601_s22 }
0x1182   :  { %v1319_v39 = vpop.permute.xlu1 %1318 }
0x1183   :  { %v1321_v36 = vmul.f32 %v1319_v39, %v1313_v32 }
0x1185   :  { %1323 = vrot.lane.b32.xlu1 %v1321_v36, %s2601_s22 }
0x11be   :  { %v1420_v41 = vpop.permute.xlu2 %1419 }
0x11bf   :  { %v1422_v30 = vadd.f32 %v1420_v41, %v1412_v37  ;;  %v2193_v37 = vld [vmem:[#allocation13 + $0x20] sm:$0xff]  ;;  %v2240_v41 = vld [vmem:[%s3066_s9] ss:$0 sm:$0xff] }
0x11c1   :  { %2366 = vtanh.f32 %v1422_v30 }
0x11c7   :  { %v2367_v21 = vpop.eup %2366 }
0x11c8   :  { %1425 = vrot.lane.b32.xlu1 %v2367_v21, %s2592_s13 }
0x11f7   :  { %v1324_v43 = vpop.permute.xlu1 %1323 }
0x11f8   :  { %v1326_v45 = vadd.f32 %v1324_v43, %v1316_v42 }
0x11fa   :  { %2368 = vtanh.f32 %v1326_v45 }
0x1200   :  { %v2369_v25 = vpop.eup %2368 }
0x1201   :  { %1329 = vrot.lane.b32.xlu0 %v2369_v25, %s2592_s13  ;;  %v2196_v25 = vld [vmem:[#allocation13 + $0x38] sm:$0xff] }
0x1202   :  { %1686 = vmatpush.bf16.msra.mxu3 %v2196_v25 }
0x123a   :  { %v1426_v46 = vpop.permute.xlu1 %1425 }
0x123b   :  { %v1428_v23 = vmul.f32 %v1426_v46, %v1409_v22  ;;  %v2195_v46 = vld [vmem:[#allocation13 + $0x30] sm:$0xff] }
0x123c   :  { %1687 = vmatpush.bf16.msra.mxu3 %v2195_v46 }
0x123d   :  { %1430 = vrot.lane.b32.xlu2 %v1428_v23, %s2601_s22  ;;  %v2241_v23 = vld [vmem:[%s3066_s9 + $0x1] ss:$0 sm:$0xff] }
0x1273   :  { %v1330_v4 = vpop.permute.xlu0 %1329 }
0x1274   :  { %v1332_v2 = vmul.f32 %v1330_v4, %v1313_v32 }
0x1276   :  { %1434 = vrot.lane.b32.xlu0 %v1332_v2, %s2592_s13  ;;  %v1333_v8 = vpack.c.bf16 %v1332_v2, %v1332_v2 }
0x1297   :  { %v1431_v50 = vpop.permute.xlu2 %1430 }
0x12e8   :  { %v1435_v7 = vpop.permute.xlu0 %1434 }
0x12e9   :  { %v1437_v51 = vsel %vm240_vm4, %v1431_v50, %v1435_v7 }
0x12ea   :  { %v1438_v53 = vpack.c.bf16 %v1437_v51, %v1437_v51 }
0x12ec   :  { %2058 = vmatmul.msk.bf16.vlgmr.msrb.gmra.mxu1 %vm328_vm5, %v1438_v53  ;;  %v2198_v53 = vld [vmem:[#allocation13 + $0x48] sm:$0xff] }
0x1369   :  { %v1451_v38 = vpop.f32.mrf.mxu1 }
0x136a   :  { %v1452_v55 = vadd.f32 %v2947_v47, %v1451_v38  ;;  %v2197_v38 = vld [vmem:[#allocation13 + $0x40] sm:$0xff] }
0x136c   :  { %2370 = vtanh.f32 %v1452_v55  ;;  %v2059_v49 = vmul.f32 -1.442695, %v1452_v55  ;;  %v2242_v55 = vld [vmem:[%s3066_s9 + $0x2] ss:$0 sm:$0xff] }
0x136e   :  { %2372 = vpow2.f32 %v2059_v49 }
0x1371   :  { %v1453_v54 = vpop.f32.mrf.mxu1 }
0x1372   :  { %v2371_v33 = vpop.eup %2370 }
0x1373   :  { %1477 = vrot.lane.b32.xlu1 %v2371_v33, %s2592_s13 }
0x1374   :  { %v2373_v57 = vpop.eup %2372 }
0x1375   :  { %v1458_v40 = vadd.f32 1.0, %v2373_v57 }
0x1377   :  { %2374 = vrcp.f32 %v1458_v40  ;;  %v1470_v0 = vand.u32 2147483648, %v1458_v40  ;;  %vm1464_vm5 = vweird.f32 %v1458_v40  ;;  %v1468_v44 = vand.u32 2147483647, %v1458_v40 }
0x1379   :  { %v1471_v5 = vor.u32 1.1754944e-38, %v1470_v0  ;;  %vm1469_vm8 = vcmp.eq.f32.partialorder %v1468_v44, 8.507059e+37 }
0x137d   :  { %v2375_v58 = vpop.eup %2374 }
0x137e   :  { %v1460_v35 = vmul.f32 %v2375_v58, %v1458_v40  ;;  %vm1465_vm6 = vweird.f32 %v2375_v58 }
0x137f   :  { %vm1466_vm7 = vmor %vm1464_vm5, %vm1465_vm6 }
0x1380   :  { %v1461_v60 = vsub.f32 1.0, %v1460_v35  ;;  %v2199_v35 = vld [vmem:[#allocation13 + $0x50] sm:$0xff] }
0x1382   :  { %v1462_v61 = vmul.f32 %v2375_v58, %v1461_v60  ;;  %v2243_v60 = vld [vmem:[%s3066_s9 + $0x3] ss:$0 sm:$0xff] }
0x1384   :  { %v1463_v62 = vadd.f32 %v2375_v58, %v1462_v61 }
0x1386   :  { %v1467_v47 = vsel %vm1466_vm7, %v2375_v58, %v1463_v62  ;;  %v2200_v58 = vld [vmem:[#allocation13 + $0x58] sm:$0xff] }
0x1387   :  { %v1472_v6 = vsel %vm1469_vm8, %v1471_v5, %v1467_v47  ;;  %1766 = vmatpush.bf16.msrb.mxu2 %v2200_v58  ;;  %v2202_v5 = vld [vmem:[#allocation13 + $0x68] sm:$0xff] }
0x1388   :  { %v1475_v10 = vmul.f32 %v1472_v6, %v1326_v45 }
0x138b   :  { %1767 = vmatpush.bf16.msrb.mxu2 %v2199_v35 }
0x13e5   :  { %v1478_v29 = vpop.permute.xlu1 %1477 }
0x13e6   :  { %v1480_v52 = vmul.f32 %v1478_v29, %v1472_v6  ;;  %v2201_v29 = vld [vmem:[#allocation13 + $0x60] sm:$0xff] }
0x13e8   :  { %1482 = vrot.lane.b32.xlu2 %v1480_v52, %s2601_s22 }
0x13f0   :  { %1340 = vrot.lane.b32.xlu2 %v1333_v8, %s2601_s22 }
0x1442   :  { %v1483_v11 = vpop.permute.xlu2 %1482 }
0x1443   :  { %v1485_v48 = vadd.f32 %v1483_v11, %v1475_v10  ;;  %v2204_v11 = vld [vmem:[#allocation13 + $0x78] sm:$0xff] }
0x1445   :  { %2376 = vtanh.f32 %v1485_v48  ;;  %v2203_v48 = vld [vmem:[#allocation13 + $0x70] sm:$0xff] }
0x144a   :  { %v1341_v12 = vpop.permute.xlu2 %1340 }
0x144b   :  { %v2377_v13 = vpop.eup %2376  ;;  %2055 = vmatmul.msk.bf16.vlgmr.msrb.gmra.mxu0 %vm240_vm4, %v1341_v12  ;;  %v2245_v12 = vld [vmem:[%s3066_s9 + $0x5] ss:$0 sm:$0xff] }
0x144c   :  { %1488 = vrot.lane.b32.xlu0 %v2377_v13, %s2592_s13  ;;  %1726 = vmatpush.bf16.msrb.mxu0 %v2198_v53 }
0x1450   :  { %1727 = vmatpush.bf16.msrb.mxu0 %v2197_v38 }
0x14be   :  { %v1489_v17 = vpop.permute.xlu0 %1488 }
0x14bf   :  { %v1491_v18 = vmul.f32 %v1489_v17, %v1472_v6  ;;  %v2244_v6 = vld [vmem:[%s3066_s9 + $0x4] ss:$0 sm:$0xff] }
0x14c1   :  { %v1492_v19 = vpack.c.bf16 %v1491_v18, %v1491_v18 }
0x14c3   :  { %1499 = vrot.lane.b32.xlu1 %v1492_v19, %s2601_s22  ;;  %v2206_v19 = vld [vmem:[#allocation13 + $0x88] sm:$0xff] }
0x14c8   :  { %v1366_v22 = vpop.f32.mrf.mxu0 }
0x14c9   :  { %v1370_v59 = vadd.f32 %v1366_v22, %v2982_v34  ;;  %v2194_v34 = vld [vmem:[#allocation13 + $0x28] sm:$0xff]  ;;  %v2205_v22 = vld [vmem:[#allocation13 + $0x80] sm:$0xff] }
0x14ca   :  { %1646 = vmatpush.bf16.msra.mxu1 %v2194_v34  ;;  %v2248_v34 = vld [vmem:[%s3066_s9 + $0x8] ss:$0 sm:$0xff] }
0x14ce   :  { %1647 = vmatpush.bf16.msra.mxu1 %v2193_v37 }
0x14d0   :  { %v1368_v24 = vpop.f32.mrf.mxu0 }
0x14d2   :  { %1806 = vmatpush.bf16.msrb.mxu1 %v2202_v5 }
0x14d6   :  { %1807 = vmatpush.bf16.msrb.mxu1 %v2201_v29 }
0x1535   :  { %v1500_v26 = vpop.permute.xlu1 %1499 }
0x1536   :  { %2068 = vmatmul.msk.bf16.vlgmr.msrb.gmra.mxu3 %vm240_vm4, %v1500_v26 }
0x1537   :  { %1846 = vmatpush.bf16.msrb.mxu3 %v2204_v11 }
0x153b   :  { %1847 = vmatpush.bf16.msrb.mxu3 %v2203_v48 }
0x15b9   :  { %v1525_v1 = vpop.f32.mrf.mxu3 }
0x15ba   :  { %v1529_v20 = vadd.f32 %v1525_v1, %v1370_v59  ;;  %v2246_v59 = vld [vmem:[%s3066_s9 + $0x6] ss:$0 sm:$0xff]  ;;  %v2247_v1 = vld [vmem:[%s3066_s9 + $0x7] ss:$0 sm:$0xff] }
0x15bc   :  { %v1534_v3 = vadd.f32 %v2239_v31, %v1529_v20  ;;  %v2207_v31 = vld [vmem:[%s3067_s10] sm:$0xff] }
0x15be   :  { %v1535_v39 = vmax.f32 %v1534_v3, 0.0 }
0x15c0   :  { %v1536_v32 = vpack.c.bf16 %v1535_v39, %v1535_v39 }
0x15c1   :  { %v1527_v36 = vpop.f32.mrf.mxu3 }
0x15c2   :  { %2077 = vmatmul.msk.bf16.vlgmr.msra.gmra.mxu0 %vm240_vm4, %v1536_v32 }
0x15c3   :  { %1886 = vmatpush.bf16.msra.mxu0 %v2206_v19 }
0x15c7   :  { %1887 = vmatpush.bf16.msra.mxu0 %v2205_v22 }
0x163f   :  { %v1569_v30 = vpop.f32.mrf.mxu0 }
0x1640   :  { %v1570_v21 = vadd.f32 %v2240_v41, %v1569_v30 }
0x1642   :  { %v1573_v42 = vmax.f32 %v1570_v21, 0.0 }
0x1644   :  { %v1574_v43 = vpack.c.bf16 %v1573_v42, %v1573_v42 }
0x1646   :  { %2087 = vmatmul.msk.bf16.vlgmr.msra.gmra.mxu2 %vm240_vm4, %v1574_v43  ;;  %v2249_v43 = vld [vmem:[%s3068_s11] ss:$0 sm:$0xff] }
0x1647   :  { %v1571_v45 = vpop.f32.mrf.mxu0  ;;  %1924 = vmatpush.bf16.msra.mxu2 %v2208_v28 }
0x164b   :  { %1925 = vmatpush.bf16.msra.mxu2 %v2207_v31 }
0x16c9   :  { %v1609_v4 = vpop.f32.mrf.mxu2 }
0x16ca   :  { %v1610_v2 = vadd.f32 %v2241_v23, %v1609_v4 }
0x16cc   :  { %v1613_v50 = vmax.f32 %v1610_v2, 0.0 }
0x16ce   :  { %v1614_v7 = vpack.c.bf16 %v1613_v50, %v1613_v50 }
0x16d0   :  { %2097 = vmatmul.msk.bf16.vlgmr.msra.gmra.mxu1 %vm240_vm4, %v1614_v7 }
0x16d1   :  { %v1611_v51 = vpop.f32.mrf.mxu2 }
0x174d   :  { %v1649_v54 = vpop.f32.mrf.mxu1 }
0x174e   :  { %v1650_v33 = vadd.f32 %v2242_v55, %v1649_v54 }
0x1750   :  { %v1653_v49 = vmax.f32 %v1650_v33, 0.0 }
0x1752   :  { %v1654_v57 = vpack.c.bf16 %v1653_v49, %v1653_v49 }
0x1754   :  { %2107 = vmatmul.msk.bf16.vlgmr.msra.gmra.mxu3 %vm240_vm4, %v1654_v57 }
0x1755   :  { %v1651_v40 = vpop.f32.mrf.mxu1 }
0x17d7   :  { %v1689_v61 = vpop.f32.mrf.mxu3 }
0x17d8   :  { %v1690_v62 = vadd.f32 %v2243_v60, %v1689_v61 }
0x17da   :  { %v1693_v0 = vmax.f32 %v1690_v62, 0.0 }
0x17dc   :  { %v1694_v44 = vpack.c.bf16 %v1693_v0, %v1693_v0 }
0x17de   :  { %2117 = vmatmul.msk.bf16.vlgmr.msrb.gmra.mxu0 %vm240_vm4, %v1694_v44 }
0x17df   :  { %v1691_v47 = vpop.f32.mrf.mxu3 }
0x185b   :  { %v1729_v52 = vpop.f32.mrf.mxu0 }
0x185c   :  { %v1730_v8 = vadd.f32 %v2244_v6, %v1729_v52 }
0x185e   :  { %v1733_v56 = vmax.f32 %v1730_v8, 0.0 }
0x1860   :  { %v1734_v9 = vpack.c.bf16 %v1733_v56, %v1733_v56 }
0x1862   :  { %2127 = vmatmul.msk.bf16.vlgmr.msrb.gmra.mxu2 %vm240_vm4, %v1734_v9 }
0x1863   :  { %v1731_v10 = vpop.f32.mrf.mxu0 }
0x18e5   :  { %v1769_v13 = vpop.f32.mrf.mxu2 }
0x18e6   :  { %v1770_v14 = vadd.f32 %v2245_v12, %v1769_v13 }
0x18e8   :  { %v1773_v15 = vmax.f32 %v1770_v14, 0.0 }
0x18ea   :  { %v1774_v17 = vpack.c.bf16 %v1773_v15, %v1773_v15 }
0x18ec   :  { %2137 = vmatmul.msk.bf16.vlgmr.msrb.gmra.mxu1 %vm240_vm4, %v1774_v17 }
0x18ed   :  { %v1771_v18 = vpop.f32.mrf.mxu2 }
0x1969   :  { %v1809_v24 = vpop.f32.mrf.mxu1 }
0x196a   :  { %v1810_v63 = vadd.f32 %v2246_v59, %v1809_v24 }
0x196c   :  { %v1813_v26 = vmax.f32 %v1810_v63, 0.0 }
0x196e   :  { %v1814_v16 = vpack.c.bf16 %v1813_v26, %v1813_v26 }
0x1970   :  { %2147 = vmatmul.msk.bf16.vlgmr.msrb.gmra.mxu3 %vm240_vm4, %v1814_v16 }
0x1971   :  { %v1811_v27 = vpop.f32.mrf.mxu1 }
0x19f3   :  { %v1849_v20 = vpop.f32.mrf.mxu3 }
0x19f4   :  { %v1850_v3 = vadd.f32 %v2247_v1, %v1849_v20 }
0x19f6   :  { %v1853_v39 = vmax.f32 %v1850_v3, 0.0 }
0x19f8   :  { %v1854_v32 = vpack.c.bf16 %v1853_v39, %v1853_v39 }
0x19fa   :  { %2157 = vmatmul.msk.bf16.vlgmr.msra.gmra.mxu0 %vm240_vm4, %v1854_v32 }
0x19fb   :  { %v1851_v36 = vpop.f32.mrf.mxu3 }
0x1a77   :  { %v1889_v37 = vpop.f32.mrf.mxu0 }
0x1a78   :  { %v1890_v41 = vadd.f32 %v2248_v34, %v1889_v37 }
0x1a7a   :  { %v1893_v30 = vmax.f32 %v1890_v41, 0.0 }
0x1a7c   :  { %v1894_v21 = vpack.c.bf16 %v1893_v30, %v1893_v30 }
0x1a7e   :  { %2166 = vmatmul.msk.bf16.vlgmr.msra.gmra.mxu2 %vm240_vm4, %v1894_v21 }
0x1a7f   :  { %v1891_v42 = vpop.f32.mrf.mxu0 }
0x1b01   :  { %v1927_v45 = vpop.f32.mrf.mxu2 }
0x1b02   :  { %v1928_v25 = vadd.f32 %v2249_v43, %v1927_v45 }
0x1b04   :  { %1932 = vst.msk [vmem:[%s3069_s12] sm:$0xff] %vm1931_vm9, %v1928_v25 }
0x1b09   :  { %v1929_v46 = vpop.f32.mrf.mxu2 }
0x1b0a   :  { %1937 = vsyncpa [#allocation3], 1 }
0x1b0b   :  { %1938 = vsyncpa [#allocation5], 1 }
0x1b0c   :  { %1939 = vsyncpa [#allocation8], 1 }
0x1b0d   :  { %1940 = vsyncpa [#allocation11], 1 }
0x1b0e   :  { %1941 = vsyncpa [#allocation14], 1 }

</bundles_post_ra>
